<compile_context>
chip_gen: v6e
topology: v6e:2x2x1
jax: 0.10.0
libtpu: 0.0.40
codegen_flags: <defaults>
</compile_context>

<pallas_src>
import functools

import jax
import jax.numpy as jnp
from jax import lax
from jax.experimental import pallas as pl
from jax.experimental.pallas import tpu as pltpu

LN_EPS = 1e-5        # torch_geometric LayerNorm eps
COORS_EPS = 1e-8     # CoorsNorm eps

# Rows of the packed small-parameter block (one per-layer DMA instead of ~11 tiny ones).
(_ROW_W1C, _ROW_B1, _ROW_B2, _ROW_BP1, _ROW_BP2,
 _ROW_BU1, _ROW_BU2, _ROW_LNG, _ROW_LNB) = range(9)
_N_SMALL_ROWS = 9


def _act(h):
    # `act()` of the torch module; SiLU chosen as the activation instance (EUP path).
    return jax.nn.silu(h)


def egnn_fused_kernel(
    x_in_ref, pos_in_ref, oh_src_ref, oh_dst_ref, oh_dst_t_ref, deg_ref,   # resident
    w1a_ref, w1b_ref, w2_ref, wp1_ref, wp2_ref, wu1_ref, wu2_ref,          # per-layer bf16
    small_ref,                                                              # per-layer packed f32
    x_out_ref, pos_out_ref,
):
    f32, bf16 = jnp.float32, jnp.bfloat16
    layer = pl.program_id(0)

    N, F = x_in_ref.shape
    E = oh_src_ref.shape[0]
    H = w2_ref.shape[0]
    O = wu2_ref.shape[1]

    # ---- carry x/pos across layers in the resident VMEM output blocks ----
    @pl.when(layer == 0)
    def _():
        x_out_ref[...] = x_in_ref[...]
        pos_out_ref[...] = pos_in_ref[...]

    x = x_out_ref[...]            # [N, F] f32 (state from previous layer)
    pos = pos_out_ref[...]        # [N, 3] f32

    deg_dst = deg_ref[:, 0:1]     # [N,1] in-degree (as destination)
    deg_src = deg_ref[:, 1:2]     # [N,1] out-degree (as source)
    deg_inv = deg_ref[:, 2:3]     # [N,1] 1 / max(in-degree, 1)

    ln_g = small_ref[_ROW_LNG:_ROW_LNG + 1, :F]
    ln_b = small_ref[_ROW_LNB:_ROW_LNB + 1, :F]

    inv_ef = 1.0 / float(E * F)

    def graph_ln(deg_w):
        # PyG LayerNorm(mode='graph') over the gathered [E,F] tensor, computed exactly at
        # node level via degree weights (two-pass variance for numerical robustness).
        m = jnp.sum(deg_w * x) * inv_ef
        d = x - m
        var = jnp.sum(deg_w * d * d) * inv_ef
        inv = 1.0 / (jnp.sqrt(var) + LN_EPS)
        return d * inv * ln_g + ln_b

    xn_i = graph_ln(deg_dst)      # normalized node features with destination-side stats
    xn_j = graph_ln(deg_src)      # normalized node features with source-side stats

    # ---- message_net first layer at NODE level (commutes with the one-hot gather) ----
    hd = jnp.dot(xn_i.astype(bf16), w1a_ref[...], preferred_element_type=f32)   # [N, H]
    hs = jnp.dot(xn_j.astype(bf16), w1b_ref[...], preferred_element_type=f32)   # [N, H]

    # ---- ONE fused gather per side: [E,N] @ [N, H+3]  (features + coordinates) ----
    # (bf16 MXU path; pos/hd/hs rounded to bf16 — accepted inference rounding.)
    gi = jnp.dot(oh_dst_ref[...],
                 jnp.concatenate([hd, pos], axis=-1).astype(bf16),
                 preferred_element_type=f32)                                      # [E, H+3]
    gj = jnp.dot(oh_src_ref[...],
                 jnp.concatenate([hs, pos], axis=-1).astype(bf16),
                 preferred_element_type=f32)                                      # [E, H+3]

    h_i, pos_i = gi[:, :H], gi[:, H:]
    h_j, pos_j = gj[:, :H], gj[:, H:]

    pos_dir = pos_i - pos_j                                                       # [E, 3]
    sumsq = jnp.sum(pos_dir * pos_dir, axis=-1, keepdims=True)                    # [E, 1]
    dist = jnp.sqrt(sumsq)

    # ---- message_net: Linear(2F+1,H) -> dropout(id) -> act -> Linear(H,H) ----
    h = (h_i + h_j
         + dist * small_ref[_ROW_W1C:_ROW_W1C + 1, :H]
         + small_ref[_ROW_B1:_ROW_B1 + 1, :H])
    h = _act(h)
    node_msg = (jnp.dot(h.astype(bf16), w2_ref[...], preferred_element_type=f32)
                + small_ref[_ROW_B2:_ROW_B2 + 1, :H])                             # [E, H]

    # ---- pos_net (CoorsNorm scale pre-folded into wp2 / bp2 by the wrapper) ----
    p = (jnp.dot(node_msg.astype(bf16), wp1_ref[...], preferred_element_type=f32)
         + small_ref[_ROW_BP1:_ROW_BP1 + 1, :H])
    p = _act(p)
    p = (jnp.dot(p.astype(bf16), wp2_ref[...], preferred_element_type=f32)
         + small_ref[_ROW_BP2:_ROW_BP2 + 1, :1])                                  # [E, 1]

    # ---- CoorsNorm(pos_dir) * pos_net(...): rsqrt (EUP) on the shared squared norm ----
    inv_nrm = lax.rsqrt(jnp.maximum(sumsq, COORS_EPS * COORS_EPS))
    pos_msg = pos_dir * (inv_nrm * p)                                             # [E, 3]

    # ---- ONE fused scatter-sum: [N,E] @ [E, H+3]; mean via precomputed 1/deg ----
    msg = jnp.concatenate([node_msg, pos_msg], axis=-1).astype(bf16)              # [E, H+3]
    agg = jnp.dot(oh_dst_t_ref[...], msg, preferred_element_type=f32)             # [N, H+3]
    agg_node = agg[:, :H]
    agg_pos = agg[:, H:] * deg_inv

    # ---- update_net: single K=F+H dot on concat(x, agg_node) -> act -> Linear(H,O) ----
    u = (jnp.dot(jnp.concatenate([x, agg_node], axis=-1).astype(bf16),
                 wu1_ref[...], preferred_element_type=f32)
         + small_ref[_ROW_BU1:_ROW_BU1 + 1, :H])
    u = _act(u)
    x_new = (jnp.dot(u.astype(bf16), wu2_ref[...], preferred_element_type=f32)
             + small_ref[_ROW_BU2:_ROW_BU2 + 1, :O])                              # [N, O]

    x_out_ref[...] = x + x_new            # residual connection (F == O)
    pos_out_ref[...] = pos + agg_pos      # update_coords=True


def _resident_spec(shape):
    # Whole-array block with a constant index_map: DMA'd once / resident across layers.
    zeros = (0,) * len(shape)
    return pl.BlockSpec(tuple(shape), lambda l, _z=zeros: _z)


def _per_layer_spec(per_layer_shape):
    # One layer's slice of an [L, *shape] stacked parameter; leading dim squeezed out.
    zeros = (0,) * len(per_layer_shape)
    return pl.BlockSpec((None,) + tuple(per_layer_shape),
                        lambda l, _z=zeros: (l,) + _z)


def _vmem_limit_bytes(resident_bytes, per_layer_bytes, num_edges):
    # Size the scoped VMEM limit from the actual footprint, capped at 85% of the
    # physical per-core VMEM (64 MiB on v7x, 128 MiB on v5e/v6e).
    cap = 64 * 1024 * 1024
    try:
        info = pltpu.get_tpu_info()
        for name in ("vmem_capacity_bytes", "vmem_bytes", "vmem_size_bytes"):
            v = getattr(info, name, None)
            if v:
                cap = int(v)
                break
    except Exception:
        pass
    need = (2 * resident_bytes            # resident blocks (conservatively double-buffered)
            + 2 * per_layer_bytes         # double-buffered per-layer weights
            + 16 * num_edges * 128 * 4    # [E, <=128-lane] f32 intermediates
            + (8 << 20))                  # compiler scratch headroom
    return int(min(max(need, 32 << 20), int(cap * 0.85)))


@functools.partial(jax.jit, static_argnames=("num_nodes",))
def egnn_forward(x, pos, edge_index, big_params, small_params, *, num_nodes):
    # PyG MessagePassing (flow='source_to_target'): j = edge_index[0], i = edge_index[1]
    src, dst = edge_index[0], edge_index[1]
    bf16 = jnp.bfloat16
    oh_src = jax.nn.one_hot(src, num_nodes, dtype=bf16)               # [E, N]
    oh_dst = jax.nn.one_hot(dst, num_nodes, dtype=bf16)               # [E, N]
    oh_dst_t = jax.nn.one_hot(dst, num_nodes, dtype=bf16, axis=0)     # [N, E] pre-transposed

    # Degrees are constant across layers -> precompute once; pack into one resident block.
    deg_dst = jnp.zeros((num_nodes,), jnp.float32).at[dst].add(1.0)
    deg_src = jnp.zeros((num_nodes,), jnp.float32).at[src].add(1.0)
    deg_inv = 1.0 / jnp.maximum(deg_dst, 1.0)
    deg = jnp.stack([deg_dst, deg_src, deg_inv], axis=-1)             # [N, 3]

    N, F = x.shape
    E = oh_src.shape[0]
    L = big_params[0].shape[0]

    resident = (x, pos, oh_src, oh_dst, oh_dst_t, deg)
    in_specs = [
        _resident_spec((N, F)),
        _resident_spec((N, 3)),
        _resident_spec((E, N)),
        _resident_spec((E, N)),
        _resident_spec((N, E)),
        _resident_spec((N, 3)),
    ]
    for w in big_params:
        in_specs.append(_per_layer_spec(w.shape[1:]))
    in_specs.append(_per_layer_spec(small_params.shape[1:]))

    resident_bytes = sum(a.size * a.dtype.itemsize for a in resident)
    per_layer_bytes = (sum(w.size * w.dtype.itemsize for w in big_params)
                       + small_params.size * small_params.dtype.itemsize) // L

    return pl.pallas_call(
        egnn_fused_kernel,
        out_shape=(jax.ShapeDtypeStruct((N, F), jnp.float32),
                   jax.ShapeDtypeStruct((N, 3), jnp.float32)),
        grid=(L,),
        in_specs=in_specs,
        out_specs=(_resident_spec((N, F)), _resident_spec((N, 3))),
        compiler_params=pltpu.CompilerParams(
            dimension_semantics=("arbitrary",),   # layer axis carries x/pos
            vmem_limit_bytes=_vmem_limit_bytes(resident_bytes, per_layer_bytes, E)),
    )(*resident, *big_params, small_params)


# ------------------------ deterministic parameter init ------------------------

def _xavier(key, out_dim, in_dim, gain=1.0):
    std = gain * (2.0 / (in_dim + out_dim)) ** 0.5
    return std * jax.random.normal(key, (out_dim, in_dim), dtype=jnp.float32)


def make_layer_params(key, node_features, hidden_features, out_features,
                      norm_coors_scale_init=0.01, initialization_gain=1.0):
    F, H, O = node_features, hidden_features, out_features
    keys = jax.random.split(key, 6)
    # message_net: Linear(2F+1, H), Linear(H, H)   (edge_features = 1 -> dist)
    w1 = _xavier(keys[0], H, 2 * F + 1, initialization_gain)
    w2 = _xavier(keys[1], H, H, initialization_gain)
    # pos_net: Linear(H, H), Linear(H, 1)
    wp1 = _xavier(keys[2], H, H, initialization_gain)
    wp2 = _xavier(keys[3], 1, H, initialization_gain)
    # update_net: Linear(F + H, H), Linear(H, O)
    wu1 = _xavier(keys[4], H, F + H, initialization_gain)
    wu2 = _xavier(keys[5], O, H, initialization_gain)
    s = norm_coors_scale_init
    zeros = lambda n: jnp.zeros((n,), jnp.float32)
    return dict(
        # big matrices ([in, out] layout for the kernel); CoorsNorm scale folded into wp2
        w1a=w1[:, :F].T, w1b=w1[:, F:2 * F].T,
        w2=w2.T, wp1=wp1.T, wp2=wp2.T * s,
        wu1=wu1.T, wu2=wu2.T,
        # small vectors -> packed into one per-layer block (bp2 also pre-scaled by s)
        w1c=w1[:, 2 * F], b1=zeros(H), b2=zeros(H),
        bp1=zeros(H), bp2=zeros(1) * s,
        bu1=zeros(H), bu2=zeros(O),
        ln_g=jnp.ones((F,), jnp.float32), ln_b=zeros(F),
    )


_BIG_KEYS = ("w1a", "w1b", "w2", "wp1", "wp2", "wu1", "wu2")
_SMALL_KEYS = ("w1c", "b1", "b2", "bp1", "bp2", "bu1", "bu2", "ln_g", "ln_b")
assert len(_SMALL_KEYS) == _N_SMALL_ROWS


def stack_layer_params(layer_params):
    # Large matrices: stacked bf16 (streamed per layer).  Small params: one packed
    # [L, 9, 128*k] f32 block -> a single extra DMA per layer.
    big = tuple(jnp.stack([lp[k] for lp in layer_params]).astype(jnp.bfloat16)
                for k in _BIG_KEYS)
    L = len(layer_params)
    width = max(layer_params[0][k].shape[0] for k in _SMALL_KEYS)
    width = -(-width // 128) * 128
    small = jnp.zeros((L, _N_SMALL_ROWS, width), jnp.float32)
    for li, lp in enumerate(layer_params):
        for pi, k in enumerate(_SMALL_KEYS):
            v = lp[k]
            small = small.at[li, pi, :v.shape[0]].set(v)
    return big, small


if __name__ == "__main__":
    node_features = 32      # == out_features (residual requires equality)
    hidden_features = 32
    out_features = 32
    num_layers = 2
    N = 16                  # nodes
    E = 48                  # edges

    key = jax.random.PRNGKey(0)
    kx, kp, ke, kw = jax.random.split(key, 4)

    x = jax.random.normal(kx, (N, node_features), dtype=jnp.float32)
    pos = jax.random.normal(kp, (N, 3), dtype=jnp.float32)
    edge_index = jax.random.randint(ke, (2, E), 0, N, dtype=jnp.int32)

    layer_params = [
        make_layer_params(k, node_features, hidden_features, out_features)
        for k in jax.random.split(kw, num_layers)
    ]
    big_params, small_params = stack_layer_params(layer_params)

    x_out, pos_out = egnn_forward(x, pos, edge_index, big_params, small_params,
                                  num_nodes=N)
    jax.block_until_ready((x_out, pos_out))

    assert x_out.shape == (N, out_features) and pos_out.shape == (N, 3)
    assert bool(jnp.all(jnp.isfinite(x_out))) and bool(jnp.all(jnp.isfinite(pos_out)))
    print("KERNEL_OK")
</pallas_src>

<mosaic_0001>
module attributes {stable_mosaic.version = 11 : i64} {
  func.func private @main(%arg0: i32) attributes {dimension_semantics = [#tpu.dimension_semantics<core_parallel>], iteration_bounds = array<i64: 2>, tpu.core_type = #tpu.core_type<sc_scalar_subcore>, window_params = []} {
    return
  }
}

module attributes {stable_mosaic.version = 11 : i64} {
  func.func private @main(%arg0: i32) attributes {dimension_semantics = [#tpu.dimension_semantics<core_parallel>], iteration_bounds = array<i64: 2>, tpu.core_type = #tpu.core_type<sc_scalar_subcore>, window_params = []} {
    return
  }
}

module attributes {stable_mosaic.version = 11 : i64} {
  func.func @egnn_fused_kernel(%arg0: i32, %arg1: memref<16x32xf32, #tpu.memory_space<vmem>>, %arg2: memref<16x3xf32, #tpu.memory_space<vmem>>, %arg3: memref<48x16xbf16, #tpu.memory_space<vmem>>, %arg4: memref<48x16xbf16, #tpu.memory_space<vmem>>, %arg5: memref<16x48xbf16, #tpu.memory_space<vmem>>, %arg6: memref<16x3xf32, #tpu.memory_space<vmem>>, %arg7: memref<1x32x32xbf16, #tpu.memory_space<vmem>>, %arg8: memref<1x32x32xbf16, #tpu.memory_space<vmem>>, %arg9: memref<1x32x32xbf16, #tpu.memory_space<vmem>>, %arg10: memref<1x32x32xbf16, #tpu.memory_space<vmem>>, %arg11: memref<1x32x1xbf16, #tpu.memory_space<vmem>>, %arg12: memref<1x64x32xbf16, #tpu.memory_space<vmem>>, %arg13: memref<1x32x32xbf16, #tpu.memory_space<vmem>>, %arg14: memref<1x9x128xf32, #tpu.memory_space<vmem>>, %arg15: memref<16x32xf32, #tpu.memory_space<vmem>>, %arg16: memref<16x3xf32, #tpu.memory_space<vmem>>) attributes {dimension_semantics = [#tpu.dimension_semantics<arbitrary>], iteration_bounds = array<i64: 2>, scalar_prefetch = 0 : i64, scratch_operands = 0 : i64, tpu.core_type = #tpu.core_type<tc>, window_params = [{pipeline_mode = #tpu.pipeline_mode<synchronous>, transform_indices = @transform_0, window_bounds = array<i64: 16, 32>}, {pipeline_mode = #tpu.pipeline_mode<synchronous>, transform_indices = @transform_1, window_bounds = array<i64: 16, 3>}, {pipeline_mode = #tpu.pipeline_mode<synchronous>, transform_indices = @transform_2, window_bounds = array<i64: 48, 16>}, {pipeline_mode = #tpu.pipeline_mode<synchronous>, transform_indices = @transform_3, window_bounds = array<i64: 48, 16>}, {pipeline_mode = #tpu.pipeline_mode<synchronous>, transform_indices = @transform_4, window_bounds = array<i64: 16, 48>}, {pipeline_mode = #tpu.pipeline_mode<synchronous>, transform_indices = @transform_5, window_bounds = array<i64: 16, 3>}, {transform_indices = @transform_6, window_bounds = array<i64: 1, 32, 32>}, {transform_indices = @transform_7, window_bounds = array<i64: 1, 32, 32>}, {transform_indices = @transform_8, window_bounds = array<i64: 1, 32, 32>}, {transform_indices = @transform_9, window_bounds = array<i64: 1, 32, 32>}, {transform_indices = @transform_10, window_bounds = array<i64: 1, 32, 1>}, {transform_indices = @transform_11, window_bounds = array<i64: 1, 64, 32>}, {transform_indices = @transform_12, window_bounds = array<i64: 1, 32, 32>}, {transform_indices = @transform_13, window_bounds = array<i64: 1, 9, 128>}, {pipeline_mode = #tpu.pipeline_mode<synchronous>, transform_indices = @transform_14, window_bounds = array<i64: 16, 32>}, {pipeline_mode = #tpu.pipeline_mode<synchronous>, transform_indices = @transform_15, window_bounds = array<i64: 16, 3>}]} {
    %c0_i32 = arith.constant 0 : i32
    %0 = arith.cmpi eq, %arg0, %c0_i32 : i32
    %1 = arith.extui %0 : i1 to i32
    %c0_i32_0 = arith.constant 0 : i32
    %2 = arith.cmpi ne, %1, %c0_i32_0 : i32
    scf.if %2 {
      %c0_86 = arith.constant 0 : index
      %c0_87 = arith.constant 0 : index
      %177 = vector.load %arg1[%c0_86, %c0_87] : memref<16x32xf32, #tpu.memory_space<vmem>>, vector<16x32xf32>
      %c0_88 = arith.constant 0 : index
      %c0_89 = arith.constant 0 : index
      %178 = vector.load %arg15[%c0_88, %c0_89] : memref<16x32xf32, #tpu.memory_space<vmem>>, vector<16x32xf32>
      tpu.vector_store %arg15[%c0_88, %c0_89], %177 {strides = array<i32>} : memref<16x32xf32, #tpu.memory_space<vmem>>, vector<16x32xf32>,
      %c0_90 = arith.constant 0 : index
      %c0_91 = arith.constant 0 : index
      %179 = vector.load %arg2[%c0_90, %c0_91] : memref<16x3xf32, #tpu.memory_space<vmem>>, vector<16x3xf32>
      %c0_92 = arith.constant 0 : index
      %c0_93 = arith.constant 0 : index
      %180 = vector.load %arg16[%c0_92, %c0_93] : memref<16x3xf32, #tpu.memory_space<vmem>>, vector<16x3xf32>
      tpu.vector_store %arg16[%c0_92, %c0_93], %179 {strides = array<i32>} : memref<16x3xf32, #tpu.memory_space<vmem>>, vector<16x3xf32>,
    } else {
    }
    %c0 = arith.constant 0 : index
    %c0_1 = arith.constant 0 : index
    %3 = vector.load %arg15[%c0, %c0_1] : memref<16x32xf32, #tpu.memory_space<vmem>>, vector<16x32xf32>
    %c0_2 = arith.constant 0 : index
    %c0_3 = arith.constant 0 : index
    %4 = vector.load %arg16[%c0_2, %c0_3] : memref<16x3xf32, #tpu.memory_space<vmem>>, vector<16x3xf32>
    %c0_4 = arith.constant 0 : index
    %c0_5 = arith.constant 0 : index
    %5 = vector.load %arg6[%c0_4, %c0_5] : memref<16x3xf32, #tpu.memory_space<vmem>>, vector<16x1xf32>
    %c0_6 = arith.constant 0 : index
    %c1 = arith.constant 1 : index
    %6 = vector.load %arg6[%c0_6, %c1] : memref<16x3xf32, #tpu.memory_space<vmem>>, vector<16x1xf32>
    %c0_7 = arith.constant 0 : index
    %c2 = arith.constant 2 : index
    %7 = vector.load %arg6[%c0_7, %c2] : memref<16x3xf32, #tpu.memory_space<vmem>>, vector<16x1xf32>
    %c0_8 = arith.constant 0 : index
    %c7 = arith.constant 7 : index
    %c0_9 = arith.constant 0 : index
    %8 = vector.load %arg14[%c0_8, %c7, %c0_9] : memref<1x9x128xf32, #tpu.memory_space<vmem>>, vector<1x1x32xf32>
    %9 = vector.shape_cast %8 : vector<1x1x32xf32> to vector<1x32xf32>
    %c0_10 = arith.constant 0 : index
    %c8 = arith.constant 8 : index
    %c0_11 = arith.constant 0 : index
    %10 = vector.load %arg14[%c0_10, %c8, %c0_11] : memref<1x9x128xf32, #tpu.memory_space<vmem>>, vector<1x1x32xf32>
    %11 = vector.shape_cast %10 : vector<1x1x32xf32> to vector<1x32xf32>
    %12 = vector.broadcast %5 : vector<16x1xf32> to vector<16x32xf32>
    %13 = arith.mulf %12, %3 : vector<16x32xf32>
    %14 = vector.shape_cast %13 : vector<16x32xf32> to vector<1x16x32xf32>
    %cst = arith.constant dense<0.000000e+00> : vector<1xf32>
    %15 = vector.multi_reduction <add>, %14, %cst [1, 2] : vector<1x16x32xf32> to vector<1xf32>
    %16 = vector.shape_cast %15 : vector<1xf32> to vector<1x1x1xf32>
    %17 = vector.extract %16[0, 0, 0] : f32 from vector<1x1x1xf32>
    %cst_12 = arith.constant 6.51041686E-4 : f32
    %18 = arith.mulf %17, %cst_12 : f32
    %19 = vector.broadcast %18 : f32 to vector<16x32xf32>
    %20 = arith.subf %3, %19 : vector<16x32xf32>
    %21 = vector.broadcast %5 : vector<16x1xf32> to vector<16x32xf32>
    %22 = arith.mulf %21, %20 : vector<16x32xf32>
    %23 = arith.mulf %22, %20 : vector<16x32xf32>
    %24 = vector.shape_cast %23 : vector<16x32xf32> to vector<1x16x32xf32>
    %cst_13 = arith.constant dense<0.000000e+00> : vector<1xf32>
    %25 = vector.multi_reduction <add>, %24, %cst_13 [1, 2] : vector<1x16x32xf32> to vector<1xf32>
    %26 = vector.shape_cast %25 : vector<1xf32> to vector<1x1x1xf32>
    %27 = vector.extract %26[0, 0, 0] : f32 from vector<1x1x1xf32>
    %cst_14 = arith.constant 6.51041686E-4 : f32
    %28 = arith.mulf %27, %cst_14 : f32
    %29 = math.sqrt %28 : f32
    %cst_15 = arith.constant 9.99999974E-6 : f32
    %30 = arith.addf %29, %cst_15 : f32
    %cst_16 = arith.constant 1.000000e+00 : f32
    %31 = arith.divf %cst_16, %30 : f32
    %32 = vector.broadcast %31 : f32 to vector<16x32xf32>
    %33 = arith.mulf %20, %32 : vector<16x32xf32>
    %34 = vector.broadcast %9 : vector<1x32xf32> to vector<16x32xf32>
    %35 = arith.mulf %33, %34 : vector<16x32xf32>
    %36 = vector.broadcast %11 : vector<1x32xf32> to vector<16x32xf32>
    %37 = arith.addf %35, %36 : vector<16x32xf32>
    %38 = vector.broadcast %6 : vector<16x1xf32> to vector<16x32xf32>
    %39 = arith.mulf %38, %3 : vector<16x32xf32>
    %40 = vector.shape_cast %39 : vector<16x32xf32> to vector<1x16x32xf32>
    %cst_17 = arith.constant dense<0.000000e+00> : vector<1xf32>
    %41 = vector.multi_reduction <add>, %40, %cst_17 [1, 2] : vector<1x16x32xf32> to vector<1xf32>
    %42 = vector.shape_cast %41 : vector<1xf32> to vector<1x1x1xf32>
    %43 = vector.extract %42[0, 0, 0] : f32 from vector<1x1x1xf32>
    %cst_18 = arith.constant 6.51041686E-4 : f32
    %44 = arith.mulf %43, %cst_18 : f32
    %45 = vector.broadcast %44 : f32 to vector<16x32xf32>
    %46 = arith.subf %3, %45 : vector<16x32xf32>
    %47 = vector.broadcast %6 : vector<16x1xf32> to vector<16x32xf32>
    %48 = arith.mulf %47, %46 : vector<16x32xf32>
    %49 = arith.mulf %48, %46 : vector<16x32xf32>
    %50 = vector.shape_cast %49 : vector<16x32xf32> to vector<1x16x32xf32>
    %cst_19 = arith.constant dense<0.000000e+00> : vector<1xf32>
    %51 = vector.multi_reduction <add>, %50, %cst_19 [1, 2] : vector<1x16x32xf32> to vector<1xf32>
    %52 = vector.shape_cast %51 : vector<1xf32> to vector<1x1x1xf32>
    %53 = vector.extract %52[0, 0, 0] : f32 from vector<1x1x1xf32>
    %cst_20 = arith.constant 6.51041686E-4 : f32
    %54 = arith.mulf %53, %cst_20 : f32
    %55 = math.sqrt %54 : f32
    %cst_21 = arith.constant 9.99999974E-6 : f32
    %56 = arith.addf %55, %cst_21 : f32
    %cst_22 = arith.constant 1.000000e+00 : f32
    %57 = arith.divf %cst_22, %56 : f32
    %58 = vector.broadcast %57 : f32 to vector<16x32xf32>
    %59 = arith.mulf %46, %58 : vector<16x32xf32>
    %60 = vector.broadcast %9 : vector<1x32xf32> to vector<16x32xf32>
    %61 = arith.mulf %59, %60 : vector<16x32xf32>
    %62 = vector.broadcast %11 : vector<1x32xf32> to vector<16x32xf32>
    %63 = arith.addf %61, %62 : vector<16x32xf32>
    %64 = arith.truncf %37 : vector<16x32xf32> to vector<16x32xbf16>
    %c0_23 = arith.constant 0 : index
    %c0_24 = arith.constant 0 : index
    %c0_25 = arith.constant 0 : index
    %65 = vector.load %arg7[%c0_23, %c0_24, %c0_25] : memref<1x32x32xbf16, #tpu.memory_space<vmem>>, vector<1x32x32xbf16>
    %66 = vector.shape_cast %65 : vector<1x32x32xbf16> to vector<32x32xbf16>
    %cst_26 = arith.constant dense<0.000000e+00> : vector<16x32xf32>
    %67 = tpu.matmul %64, %66, %cst_26 {dimension_numbers = #tpu.dot_dimension_numbers<[1], [0], [0], [1], [0, 0, 1, 1], [], []>} : vector<16x32xbf16>, vector<32x32xbf16>, vector<16x32xf32> -> vector<16x32xf32>
    %68 = arith.truncf %63 : vector<16x32xf32> to vector<16x32xbf16>
    %c0_27 = arith.constant 0 : index
    %c0_28 = arith.constant 0 : index
    %c0_29 = arith.constant 0 : index
    %69 = vector.load %arg8[%c0_27, %c0_28, %c0_29] : memref<1x32x32xbf16, #tpu.memory_space<vmem>>, vector<1x32x32xbf16>
    %70 = vector.shape_cast %69 : vector<1x32x32xbf16> to vector<32x32xbf16>
    %cst_30 = arith.constant dense<0.000000e+00> : vector<16x32xf32>
    %71 = tpu.matmul %68, %70, %cst_30 {dimension_numbers = #tpu.dot_dimension_numbers<[1], [0], [0], [1], [0, 0, 1, 1], [], []>} : vector<16x32xbf16>, vector<32x32xbf16>, vector<16x32xf32> -> vector<16x32xf32>
    %c0_31 = arith.constant 0 : index
    %c0_32 = arith.constant 0 : index
    %72 = vector.load %arg4[%c0_31, %c0_32] : memref<48x16xbf16, #tpu.memory_space<vmem>>, vector<48x16xbf16>
    %73 = tpu.concatenate %67, %4 in 1 : vector<16x32xf32>, vector<16x3xf32> -> vector<16x35xf32>
    %74 = arith.truncf %73 : vector<16x35xf32> to vector<16x35xbf16>
    %cst_33 = arith.constant dense<0.000000e+00> : vector<48x35xf32>
    %75 = tpu.matmul %72, %74, %cst_33 {dimension_numbers = #tpu.dot_dimension_numbers<[1], [0], [0], [1], [0, 0, 1, 1], [], []>} : vector<48x16xbf16>, vector<16x35xbf16>, vector<48x35xf32> -> vector<48x35xf32>
    %c0_34 = arith.constant 0 : index
    %c0_35 = arith.constant 0 : index
    %76 = vector.load %arg3[%c0_34, %c0_35] : memref<48x16xbf16, #tpu.memory_space<vmem>>, vector<48x16xbf16>
    %77 = tpu.concatenate %71, %4 in 1 : vector<16x32xf32>, vector<16x3xf32> -> vector<16x35xf32>
    %78 = arith.truncf %77 : vector<16x35xf32> to vector<16x35xbf16>
    %cst_36 = arith.constant dense<0.000000e+00> : vector<48x35xf32>
    %79 = tpu.matmul %76, %78, %cst_36 {dimension_numbers = #tpu.dot_dimension_numbers<[1], [0], [0], [1], [0, 0, 1, 1], [], []>} : vector<48x16xbf16>, vector<16x35xbf16>, vector<48x35xf32> -> vector<48x35xf32>
    %80 = vector.extract_strided_slice %75 {offsets = [0, 0], sizes = [48, 32], strides = [1, 1]} : vector<48x35xf32> to vector<48x32xf32>
    %81 = vector.extract_strided_slice %75 {offsets = [0, 32], sizes = [48, 3], strides = [1, 1]} : vector<48x35xf32> to vector<48x3xf32>
    %82 = vector.extract_strided_slice %79 {offsets = [0, 0], sizes = [48, 32], strides = [1, 1]} : vector<48x35xf32> to vector<48x32xf32>
    %83 = vector.extract_strided_slice %79 {offsets = [0, 32], sizes = [48, 3], strides = [1, 1]} : vector<48x35xf32> to vector<48x3xf32>
    %84 = arith.subf %81, %83 : vector<48x3xf32>
    %85 = arith.mulf %84, %84 : vector<48x3xf32>
    %cst_37 = arith.constant dense<0.000000e+00> : vector<48xf32>
    %86 = vector.multi_reduction <add>, %85, %cst_37 [1] : vector<48x3xf32> to vector<48xf32>
    %87 = vector.shape_cast %86 : vector<48xf32> to vector<48x1xf32>
    %88 = math.sqrt %87 : vector<48x1xf32>
    %89 = arith.addf %80, %82 : vector<48x32xf32>
    %c0_38 = arith.constant 0 : index
    %c0_39 = arith.constant 0 : index
    %c0_40 = arith.constant 0 : index
    %90 = vector.load %arg14[%c0_38, %c0_39, %c0_40] : memref<1x9x128xf32, #tpu.memory_space<vmem>>, vector<1x1x32xf32>
    %91 = vector.shape_cast %90 : vector<1x1x32xf32> to vector<1x32xf32>
    %92 = vector.broadcast %88 : vector<48x1xf32> to vector<48x32xf32>
    %93 = vector.broadcast %91 : vector<1x32xf32> to vector<48x32xf32>
    %94 = arith.mulf %92, %93 : vector<48x32xf32>
    %95 = arith.addf %89, %94 : vector<48x32xf32>
    %c0_41 = arith.constant 0 : index
    %c1_42 = arith.constant 1 : index
    %c0_43 = arith.constant 0 : index
    %96 = vector.load %arg14[%c0_41, %c1_42, %c0_43] : memref<1x9x128xf32, #tpu.memory_space<vmem>>, vector<1x1x32xf32>
    %97 = vector.shape_cast %96 : vector<1x1x32xf32> to vector<1x32xf32>
    %98 = vector.broadcast %97 : vector<1x32xf32> to vector<48x32xf32>
    %99 = arith.addf %95, %98 : vector<48x32xf32>
    %100 = arith.negf %99 : vector<48x32xf32>
    %101 = math.exp %100 : vector<48x32xf32>
    %cst_44 = arith.constant 1.000000e+00 : f32
    %102 = vector.broadcast %cst_44 : f32 to vector<48x32xf32>
    %103 = arith.addf %102, %101 : vector<48x32xf32>
    %104 = arith.divf %102, %103 : vector<48x32xf32>
    %105 = arith.mulf %99, %104 : vector<48x32xf32>
    %106 = arith.truncf %105 : vector<48x32xf32> to vector<48x32xbf16>
    %c0_45 = arith.constant 0 : index
    %c0_46 = arith.constant 0 : index
    %c0_47 = arith.constant 0 : index
    %107 = vector.load %arg9[%c0_45, %c0_46, %c0_47] : memref<1x32x32xbf16, #tpu.memory_space<vmem>>, vector<1x32x32xbf16>
    %108 = vector.shape_cast %107 : vector<1x32x32xbf16> to vector<32x32xbf16>
    %cst_48 = arith.constant dense<0.000000e+00> : vector<48x32xf32>
    %109 = tpu.matmul %106, %108, %cst_48 {dimension_numbers = #tpu.dot_dimension_numbers<[1], [0], [0], [1], [0, 0, 1, 1], [], []>} : vector<48x32xbf16>, vector<32x32xbf16>, vector<48x32xf32> -> vector<48x32xf32>
    %c0_49 = arith.constant 0 : index
    %c2_50 = arith.constant 2 : index
    %c0_51 = arith.constant 0 : index
    %110 = vector.load %arg14[%c0_49, %c2_50, %c0_51] : memref<1x9x128xf32, #tpu.memory_space<vmem>>, vector<1x1x32xf32>
    %111 = vector.shape_cast %110 : vector<1x1x32xf32> to vector<1x32xf32>
    %112 = vector.broadcast %111 : vector<1x32xf32> to vector<48x32xf32>
    %113 = arith.addf %109, %112 : vector<48x32xf32>
    %114 = arith.truncf %113 : vector<48x32xf32> to vector<48x32xbf16>
    %c0_52 = arith.constant 0 : index
    %c0_53 = arith.constant 0 : index
    %c0_54 = arith.constant 0 : index
    %115 = vector.load %arg10[%c0_52, %c0_53, %c0_54] : memref<1x32x32xbf16, #tpu.memory_space<vmem>>, vector<1x32x32xbf16>
    %116 = vector.shape_cast %115 : vector<1x32x32xbf16> to vector<32x32xbf16>
    %cst_55 = arith.constant dense<0.000000e+00> : vector<48x32xf32>
    %117 = tpu.matmul %114, %116, %cst_55 {dimension_numbers = #tpu.dot_dimension_numbers<[1], [0], [0], [1], [0, 0, 1, 1], [], []>} : vector<48x32xbf16>, vector<32x32xbf16>, vector<48x32xf32> -> vector<48x32xf32>
    %c0_56 = arith.constant 0 : index
    %c3 = arith.constant 3 : index
    %c0_57 = arith.constant 0 : index
    %118 = vector.load %arg14[%c0_56, %c3, %c0_57] : memref<1x9x128xf32, #tpu.memory_space<vmem>>, vector<1x1x32xf32>
    %119 = vector.shape_cast %118 : vector<1x1x32xf32> to vector<1x32xf32>
    %120 = vector.broadcast %119 : vector<1x32xf32> to vector<48x32xf32>
    %121 = arith.addf %117, %120 : vector<48x32xf32>
    %122 = arith.negf %121 : vector<48x32xf32>
    %123 = math.exp %122 : vector<48x32xf32>
    %cst_58 = arith.constant 1.000000e+00 : f32
    %124 = vector.broadcast %cst_58 : f32 to vector<48x32xf32>
    %125 = arith.addf %124, %123 : vector<48x32xf32>
    %126 = arith.divf %124, %125 : vector<48x32xf32>
    %127 = arith.mulf %121, %126 : vector<48x32xf32>
    %128 = arith.truncf %127 : vector<48x32xf32> to vector<48x32xbf16>
    %c0_59 = arith.constant 0 : index
    %c0_60 = arith.constant 0 : index
    %c0_61 = arith.constant 0 : index
    %129 = vector.load %arg11[%c0_59, %c0_60, %c0_61] : memref<1x32x1xbf16, #tpu.memory_space<vmem>>, vector<1x32x1xbf16>
    %130 = vector.shape_cast %129 : vector<1x32x1xbf16> to vector<32x1xbf16>
    %cst_62 = arith.constant dense<0.000000e+00> : vector<48x1xf32>
    %131 = tpu.matmul %128, %130, %cst_62 {dimension_numbers = #tpu.dot_dimension_numbers<[1], [0], [0], [1], [0, 0, 1, 1], [], []>} : vector<48x32xbf16>, vector<32x1xbf16>, vector<48x1xf32> -> vector<48x1xf32>
    %c0_63 = arith.constant 0 : index
    %c4 = arith.constant 4 : index
    %c0_64 = arith.constant 0 : index
    %132 = vector.load %arg14[%c0_63, %c4, %c0_64] : memref<1x9x128xf32, #tpu.memory_space<vmem>>, vector<1x1x1xf32>
    %133 = vector.shape_cast %132 : vector<1x1x1xf32> to vector<1x1xf32>
    %134 = vector.broadcast %133 : vector<1x1xf32> to vector<48x1xf32>
    %135 = arith.addf %131, %134 : vector<48x1xf32>
    %cst_65 = arith.constant 1.000000e-16 : f32
    %136 = vector.broadcast %cst_65 : f32 to vector<48x1xf32>
    %137 = arith.maximumf %87, %136 : vector<48x1xf32>
    %138 = math.rsqrt %137 : vector<48x1xf32>
    %139 = arith.mulf %138, %135 : vector<48x1xf32>
    %140 = vector.broadcast %139 : vector<48x1xf32> to vector<48x3xf32>
    %141 = arith.mulf %84, %140 : vector<48x3xf32>
    %142 = tpu.concatenate %113, %141 in 1 : vector<48x32xf32>, vector<48x3xf32> -> vector<48x35xf32>
    %143 = arith.truncf %142 : vector<48x35xf32> to vector<48x35xbf16>
    %c0_66 = arith.constant 0 : index
    %c0_67 = arith.constant 0 : index
    %144 = vector.load %arg5[%c0_66, %c0_67] : memref<16x48xbf16, #tpu.memory_space<vmem>>, vector<16x48xbf16>
    %cst_68 = arith.constant dense<0.000000e+00> : vector<16x35xf32>
    %145 = tpu.matmul %144, %143, %cst_68 {dimension_numbers = #tpu.dot_dimension_numbers<[1], [0], [0], [1], [0, 0, 1, 1], [], []>} : vector<16x48xbf16>, vector<48x35xbf16>, vector<16x35xf32> -> vector<16x35xf32>
    %146 = vector.extract_strided_slice %145 {offsets = [0, 0], sizes = [16, 32], strides = [1, 1]} : vector<16x35xf32> to vector<16x32xf32>
    %147 = vector.extract_strided_slice %145 {offsets = [0, 32], sizes = [16, 3], strides = [1, 1]} : vector<16x35xf32> to vector<16x3xf32>
    %148 = vector.broadcast %7 : vector<16x1xf32> to vector<16x3xf32>
    %149 = arith.mulf %147, %148 : vector<16x3xf32>
    %150 = tpu.concatenate %3, %146 in 1 : vector<16x32xf32>, vector<16x32xf32> -> vector<16x64xf32>
    %151 = arith.truncf %150 : vector<16x64xf32> to vector<16x64xbf16>
    %c0_69 = arith.constant 0 : index
    %c0_70 = arith.constant 0 : index
    %c0_71 = arith.constant 0 : index
    %152 = vector.load %arg12[%c0_69, %c0_70, %c0_71] : memref<1x64x32xbf16, #tpu.memory_space<vmem>>, vector<1x64x32xbf16>
    %153 = vector.shape_cast %152 : vector<1x64x32xbf16> to vector<64x32xbf16>
    %cst_72 = arith.constant dense<0.000000e+00> : vector<16x32xf32>
    %154 = tpu.matmul %151, %153, %cst_72 {dimension_numbers = #tpu.dot_dimension_numbers<[1], [0], [0], [1], [0, 0, 1, 1], [], []>} : vector<16x64xbf16>, vector<64x32xbf16>, vector<16x32xf32> -> vector<16x32xf32>
    %c0_73 = arith.constant 0 : index
    %c5 = arith.constant 5 : index
    %c0_74 = arith.constant 0 : index
    %155 = vector.load %arg14[%c0_73, %c5, %c0_74] : memref<1x9x128xf32, #tpu.memory_space<vmem>>, vector<1x1x32xf32>
    %156 = vector.shape_cast %155 : vector<1x1x32xf32> to vector<1x32xf32>
    %157 = vector.broadcast %156 : vector<1x32xf32> to vector<16x32xf32>
    %158 = arith.addf %154, %157 : vector<16x32xf32>
    %159 = arith.negf %158 : vector<16x32xf32>
    %160 = math.exp %159 : vector<16x32xf32>
    %cst_75 = arith.constant 1.000000e+00 : f32
    %161 = vector.broadcast %cst_75 : f32 to vector<16x32xf32>
    %162 = arith.addf %161, %160 : vector<16x32xf32>
    %163 = arith.divf %161, %162 : vector<16x32xf32>
    %164 = arith.mulf %158, %163 : vector<16x32xf32>
    %165 = arith.truncf %164 : vector<16x32xf32> to vector<16x32xbf16>
    %c0_76 = arith.constant 0 : index
    %c0_77 = arith.constant 0 : index
    %c0_78 = arith.constant 0 : index
    %166 = vector.load %arg13[%c0_76, %c0_77, %c0_78] : memref<1x32x32xbf16, #tpu.memory_space<vmem>>, vector<1x32x32xbf16>
    %167 = vector.shape_cast %166 : vector<1x32x32xbf16> to vector<32x32xbf16>
    %cst_79 = arith.constant dense<0.000000e+00> : vector<16x32xf32>
    %168 = tpu.matmul %165, %167, %cst_79 {dimension_numbers = #tpu.dot_dimension_numbers<[1], [0], [0], [1], [0, 0, 1, 1], [], []>} : vector<16x32xbf16>, vector<32x32xbf16>, vector<16x32xf32> -> vector<16x32xf32>
    %c0_80 = arith.constant 0 : index
    %c6 = arith.constant 6 : index
    %c0_81 = arith.constant 0 : index
    %169 = vector.load %arg14[%c0_80, %c6, %c0_81] : memref<1x9x128xf32, #tpu.memory_space<vmem>>, vector<1x1x32xf32>
    %170 = vector.shape_cast %169 : vector<1x1x32xf32> to vector<1x32xf32>
    %171 = vector.broadcast %170 : vector<1x32xf32> to vector<16x32xf32>
    %172 = arith.addf %168, %171 : vector<16x32xf32>
    %173 = arith.addf %3, %172 : vector<16x32xf32>
    %c0_82 = arith.constant 0 : index
    %c0_83 = arith.constant 0 : index
    %174 = vector.load %arg15[%c0_82, %c0_83] : memref<16x32xf32, #tpu.memory_space<vmem>>, vector<16x32xf32>
    tpu.vector_store %arg15[%c0_82, %c0_83], %173 {strides = array<i32>} : memref<16x32xf32, #tpu.memory_space<vmem>>, vector<16x32xf32>,
    %175 = arith.addf %4, %149 : vector<16x3xf32>
    %c0_84 = arith.constant 0 : index
    %c0_85 = arith.constant 0 : index
    %176 = vector.load %arg16[%c0_84, %c0_85] : memref<16x3xf32, #tpu.memory_space<vmem>>, vector<16x3xf32>
    tpu.vector_store %arg16[%c0_84, %c0_85], %175 {strides = array<i32>} : memref<16x3xf32, #tpu.memory_space<vmem>>, vector<16x3xf32>,
    return
  }
  func.func @transform_0(%arg0: i32) -> (i32, i32) {
    %c0_i32 = arith.constant 0 : i32
    %c0_i32_0 = arith.constant 0 : i32
    %c0_i32_1 = arith.constant 0 : i32
    return %c0_i32, %c0_i32_0 : i32, i32
  }
  func.func @transform_1(%arg0: i32) -> (i32, i32) {
    %c0_i32 = arith.constant 0 : i32
    %c0_i32_0 = arith.constant 0 : i32
    %c0_i32_1 = arith.constant 0 : i32
    return %c0_i32, %c0_i32_0 : i32, i32
  }
  func.func @transform_2(%arg0: i32) -> (i32, i32) {
    %c0_i32 = arith.constant 0 : i32
    %c0_i32_0 = arith.constant 0 : i32
    %c0_i32_1 = arith.constant 0 : i32
    return %c0_i32, %c0_i32_0 : i32, i32
  }
  func.func @transform_3(%arg0: i32) -> (i32, i32) {
    %c0_i32 = arith.constant 0 : i32
    %c0_i32_0 = arith.constant 0 : i32
    %c0_i32_1 = arith.constant 0 : i32
    return %c0_i32, %c0_i32_0 : i32, i32
  }
  func.func @transform_4(%arg0: i32) -> (i32, i32) {
    %c0_i32 = arith.constant 0 : i32
    %c0_i32_0 = arith.constant 0 : i32
    %c0_i32_1 = arith.constant 0 : i32
    return %c0_i32, %c0_i32_0 : i32, i32
  }
  func.func @transform_5(%arg0: i32) -> (i32, i32) {
    %c0_i32 = arith.constant 0 : i32
    %c0_i32_0 = arith.constant 0 : i32
    %c0_i32_1 = arith.constant 0 : i32
    return %c0_i32, %c0_i32_0 : i32, i32
  }
  func.func @transform_6(%arg0: i32) -> (i32, i32, i32) {
    %c0_i32 = arith.constant 0 : i32
    %c0_i32_0 = arith.constant 0 : i32
    %c0_i32_1 = arith.constant 0 : i32
    return %arg0, %c0_i32, %c0_i32_0 : i32, i32, i32
  }
  func.func @transform_7(%arg0: i32) -> (i32, i32, i32) {
    %c0_i32 = arith.constant 0 : i32
    %c0_i32_0 = arith.constant 0 : i32
    %c0_i32_1 = arith.constant 0 : i32
    return %arg0, %c0_i32, %c0_i32_0 : i32, i32, i32
  }
  func.func @transform_8(%arg0: i32) -> (i32, i32, i32) {
    %c0_i32 = arith.constant 0 : i32
    %c0_i32_0 = arith.constant 0 : i32
    %c0_i32_1 = arith.constant 0 : i32
    return %arg0, %c0_i32, %c0_i32_0 : i32, i32, i32
  }
  func.func @transform_9(%arg0: i32) -> (i32, i32, i32) {
    %c0_i32 = arith.constant 0 : i32
    %c0_i32_0 = arith.constant 0 : i32
    %c0_i32_1 = arith.constant 0 : i32
    return %arg0, %c0_i32, %c0_i32_0 : i32, i32, i32
  }
  func.func @transform_10(%arg0: i32) -> (i32, i32, i32) {
    %c0_i32 = arith.constant 0 : i32
    %c0_i32_0 = arith.constant 0 : i32
    %c0_i32_1 = arith.constant 0 : i32
    return %arg0, %c0_i32, %c0_i32_0 : i32, i32, i32
  }
  func.func @transform_11(%arg0: i32) -> (i32, i32, i32) {
    %c0_i32 = arith.constant 0 : i32
    %c0_i32_0 = arith.constant 0 : i32
    %c0_i32_1 = arith.constant 0 : i32
    return %arg0, %c0_i32, %c0_i32_0 : i32, i32, i32
  }
  func.func @transform_12(%arg0: i32) -> (i32, i32, i32) {
    %c0_i32 = arith.constant 0 : i32
    %c0_i32_0 = arith.constant 0 : i32
    %c0_i32_1 = arith.constant 0 : i32
    return %arg0, %c0_i32, %c0_i32_0 : i32, i32, i32
  }
  func.func @transform_13(%arg0: i32) -> (i32, i32, i32) {
    %c0_i32 = arith.constant 0 : i32
    %c0_i32_0 = arith.constant 0 : i32
    %c0_i32_1 = arith.constant 0 : i32
    return %arg0, %c0_i32, %c0_i32_0 : i32, i32, i32
  }
  func.func @transform_14(%arg0: i32) -> (i32, i32) {
    %c0_i32 = arith.constant 0 : i32
    %c0_i32_0 = arith.constant 0 : i32
    %c0_i32_1 = arith.constant 0 : i32
    return %c0_i32, %c0_i32_0 : i32, i32
  }
  func.func @transform_15(%arg0: i32) -> (i32, i32) {
    %c0_i32 = arith.constant 0 : i32
    %c0_i32_0 = arith.constant 0 : i32
    %c0_i32_1 = arith.constant 0 : i32
    return %c0_i32, %c0_i32_0 : i32, i32
  }
}

</mosaic_0001>

<bundles_post_ra>
// kernel: egnn_forward.1
= control target key start
LH: loop header
LB: loop body
LE: loop exit
PB: predicated region body
PF: predicated region fallthrough
CT: control target
= control target key end

     0   :  { %s3096_s0 = inlined_call_operand.vmem [shape: f32[16,32], index: 0, kind: input, shape index: {}]   ;;  %s3097_s1 = inlined_call_operand.vmem [shape: f32[16,3], index: 1, kind: input, shape index: {}]   ;;  %s3098_s2 = inlined_call_operand.vmem [shape: bf16[48,16], index: 2, kind: input, shape index: {}]   ;;  %s3099_s3 = inlined_call_operand.vmem [shape: bf16[48,16], index: 3, kind: input, shape index: {}]   ;;  %s3100_s4 = inlined_call_operand.vmem [shape: bf16[16,48], index: 4, kind: input, shape index: {}]   ;;  %s3101_s5 = inlined_call_operand.vmem [shape: f32[16,3], index: 5, kind: input, shape index: {}]   ;;  %s3102_s6 = inlined_call_operand.vmem [shape: bf16[2,32,32], index: 6, kind: input, shape index: {}]   ;;  %s3103_s7 = inlined_call_operand.vmem [shape: bf16[2,32,32], index: 7, kind: input, shape index: {}]   ;;  %s3104_s8 = inlined_call_operand.vmem [shape: bf16[2,32,32], index: 8, kind: input, shape index: {}]   ;;  %s3105_s9 = inlined_call_operand.vmem [shape: bf16[2,32,32], index: 9, kind: input, shape index: {}]   ;;  %s3106_s10 = inlined_call_operand.vmem [shape: bf16[2,32,1], index: 10, kind: input, shape index: {}]   ;;  %s3107_s11 = inlined_call_operand.vmem [shape: bf16[2,64,32], index: 11, kind: input, shape index: {}]   ;;  %s3108_s12 = inlined_call_operand.vmem [shape: bf16[2,32,32], index: 12, kind: input, shape index: {}]   ;;  %s3109_s13 = inlined_call_operand.vmem [shape: f32[2,9,128], index: 13, kind: input, shape index: {}]   ;;  %s3110_s14 = inlined_call_operand.hbm [shape: f32[16,32], index: 14, kind: output, shape index: {0}]   ;;  %s3111_s15 = inlined_call_operand.vmem [shape: f32[16,3], index: 15, kind: output, shape index: {1}]  }
   0x1   :  { %3113 = sst [smem:[#allocation6_spill]] %s3100_s4 }
   0x2   :  { %3114 = sst [smem:[#allocation7_spill]] %s3102_s6 }
   0x3   :  { %3115 = sst [smem:[#allocation8_spill]] %s3103_s7 }
   0x4   :  { %3116 = sst [smem:[#allocation9_spill]] %s3104_s8 }
   0x5   :  { %3117 = sst [smem:[#allocation10_spill]] %s3110_s14 }
   0x6   :  { %21 = vsyncpa [#allocation3], 0  ;;  %s2589_s18 = smov 0  }
   0x7 LB: > { %3118 = sst [smem:[#allocation5_spill]] %s2497_s18  ;;  %s2595_s19 = sadd.s32 4294967295, %s2497_s18   ;;  %s2497_s18 = sphi %s2589_s18, %s27_s18  }
   0x8   : > { %p2030_p0 = scmp.ge.s32.totalorder %s2497_s18, 1  ;;  %p501_p1 = scmp.lt.s32.totalorder %s2497_s18, 3 }
   0xa   : > { %p502_p2 = pnand %p2030_p0, %p501_p1 }
   0xb   : > { %p579_p3 = scmp.lt.s32.totalorder (!%p502_p2), %s2595_s19, 1  ;;  %s3119_s6 = sld [smem:[#allocation7_spill]] (!%p502_p2) }
   0xc   : > { %505 = sbr.rel (%p502_p2) target bundleno = 3364 (0xd24), region = 76  ;;  %s3120_s7 = sld [smem:[#allocation8_spill]] (!%p502_p2) }
   0xd   : > { %s3121_s8 = sld [smem:[#allocation9_spill]] (!%p502_p2)  ;;  %p2047_p4 = scmp.ne.s32.totalorder (!%p502_p2), %s2595_s19, 0 }
  0x11   : > { %s580_s20 = scalar_select %p579_p3, %s2595_s19, 1 }
  0x13   : > { %s2118_s21 = sshll.u32 %s580_s20, 4  ;;  %s2123_s22 = sshll.u32 %s580_s20, 5 }
  0x14   : > { %s2604_s25 = scalar_lea.vmem %s3119_s6, %s2118_s21  ;;  %s2609_s28 = scalar_lea.vmem %s3120_s7, %s2118_s21 }
  0x15   : > { %s2614_s16 = scalar_lea.vmem %s3121_s8, %s2118_s21  ;;  %s2619_s14 = scalar_lea.vmem %s3105_s9, %s2118_s21 }
  0x16   : > { %s2624_s23 = scalar_lea.vmem %s3106_s10, %s2118_s21  ;;  %s2629_s26 = scalar_lea.vmem %s3107_s11, %s2123_s22 }
  0x17   : > { %s2634_s29 = scalar_lea.vmem %s3108_s12, %s2118_s21  ;;  %s2639_s18 = scalar_lea.vmem %s3109_s13, %s2118_s21 }
  0x18   : > { %623 = sbr.rel (%p2047_p4) target bundleno = 32 (0x20), region = 80 }
  0x1d   : > { %v624_v0 = vld [vmem:[%s3096_s0] sm:$0xff]  ;;  %vm626_vm0 = vcmask 261120   ;;  %v625_v1 = vld [vmem:[%s3096_s0 + $0x8] sm:$0xff]  ;;  %vm631_vm1 = vcmask 23552  }
  0x1e   : > { %v629_v2 = vld [vmem:[%s3097_s1] sm:$0xff]  ;;  %627 = vst.msk [vmem:[#allocation2] sm:$0xff] %vm626_vm0, %v624_v0  ;;  %628 = vst.msk [vmem:[#allocation2 + $0x8] sm:$0xff] %vm626_vm0, %v625_v1  ;;  %v630_v3 = vld [vmem:[%s3097_s1 + $0x8] sm:$0xff] }
  0x1f   : > { %632 = vst.msk [vmem:[%s3111_s15] sm:$0xff] %vm631_vm1, %v629_v2  ;;  %633 = vst.msk [vmem:[%s3111_s15 + $0x8] sm:$0xff] %vm631_vm1, %v630_v3 }
  0x20 PF: > { %v638_v4 = vld [vmem:[%s3101_s5] sm:$0xff]  ;;  %v2499_v5 = vmov 0   ;;  %v639_v6 = vld [vmem:[%s3101_s5 + $0x8] sm:$0xff]  ;;  %vm654_vm2 = vcmask 261120   ;;  %v2500_v16 = vmov 1   ;;  %v2501_v50 = vmov 0.0  }
  0x21   : > { %2329 = vset.pattern.permute.xlu0 %v2499_v5  ;;  %2331 = vset.pattern.permute.xlu1 %v2500_v16  ;;  %v2346_v49 = vld [vmem:[%s2604_s25 + $0x8] sm:$0xff]   ;;  %v2347_v51 = vld [vmem:[%s2604_s25] sm:$0xff]   ;;  %vm2502_vm4 = vmmov 0   ;;  %s2503_s17 = smov 32   ;;  %vm933_vm8 = vcmask 130048   ;;  %vm1126_vm9 = vcmask 23552  }
  0x22   : > { %644 = vperm.xlu0 %2329, %v638_v4   ;;  %2167 = vmatprep.subr.bf16.mxu0 %v2501_v50  ;;  %p2309_p5 = scmp.eq.s32.totalorder %s2595_s19, 1 }
  0x23   : > { %2175 = vmatprep.subr.bf16.mxu1 %v2501_v50  ;;  %2168 = vmatpush3.bf16.msra.mxu0 %v2346_v49 }
  0x24   : > { %2169 = vmatprep.subr.bf16.mxu0 %v2501_v50  ;;  %2171 = vmatprep.mubr.msk.bf16.mxu0 %vm2502_vm4, %v2501_v50 }
  0x25   : > { %v2666_v8 = vld [vmem:[#allocation2] sm:$0xff]  ;;  %v2668_v9 = vld [vmem:[#allocation2 + $0x8] sm:$0xff]  ;;  %2179 = vmatprep.mubr.msk.bf16.mxu1 %vm2502_vm4, %v2501_v50 }
  0x26   : > { %649 = vperm.xlu0 %2329, %v639_v6   ;;  %v636_v57 = vld [vmem:[%s3111_s15] sm:$0xff]  ;;  %v637_v58 = vld [vmem:[%s3111_s15 + $0x8] sm:$0xff] }
  0x27   : > { %2170 = vmatpush3.bf16.msra.mxu0 %v2347_v51  ;;  %v2332_v59 = vpack.i.bf16 %v637_v58, %v636_v57 }
  0x28   : > { %2183 = vmatprep.subr.bf16.mxu0 %v2501_v50 }
  0x2a   : > { %2330 = vset.pattern.permute.xlu0 %v2500_v16 }
  0x2b   : > { %717 = vperm.xlu0 %2330, %v638_v4  }
  0x2f   : > { %2337 = vset.pattern.permute.xlu0 %v2499_v5 }
  0x9d   : > { %v645_v7 = vpop.permute.xlu0 %644 }
  0x9e   : > { %v652_v10 = vmul.f32 %v645_v7, %v2666_v8 }
  0xa0   : > { %v655_v13 = vsel %vm654_vm2, %v652_v10, 0.0 }
  0xa1   : > { %v650_v11 = vpop.permute.xlu0 %649 }
  0xa2   : > { %v653_v12 = vmul.f32 %v650_v11, %v2668_v9 }
  0xa4   : > { %v656_v14 = vsel %vm654_vm2, %v653_v12, 0.0 }
  0xa5   : > { %v657_v15 = vadd.f32 %v656_v14, %v655_v13 }
  0xa6   : > { %v2686_v34 = vpop.permute.xlu0 %717 }
  0xa7   : > { %658 = vadd.xlane.f32.xlu1 %v657_v15  ;;  %v724_v37 = vmul.f32 %v2686_v34, %v2666_v8 }
  0xa9   : > { %v726_v42 = vsel %vm654_vm2, %v724_v37, 0.0 }
 0x130   : > { %v659_v17 = vpop.xlane.xlu1 %658 }
 0x131   : > { %v660_v18 = vrot.slane %v659_v17, 4 }
 0x133   : > { %v661_v19 = vadd.f32 %v660_v18, %v659_v17 }
 0x135   : > { %v662_v20 = vrot.slane %v661_v19, 2 }
 0x137   : > { %v663_v21 = vadd.f32 %v662_v20, %v661_v19 }
 0x139   : > { %v664_v22 = vrot.slane %v663_v21, 1 }
 0x13b   : > { %v665_v23 = vadd.f32 %v664_v22, %v663_v21 }
 0x13d   : > { %2289 = vpush %v665_v23 }
 0x16e   : > { %s2290_s20 = spop %2289 }
 0x16f   : > { %s667_s8 = smul.f32 0.0006510417, %s2290_s20 }
 0x171   : > { %v668_v24 = vstv %s667_s8 }
 0x172   : > { %v2675_v25 = vsub.f32 %v2666_v8, %v668_v24  ;;  %v2678_v26 = vsub.f32 %v2668_v9, %v668_v24 }
 0x174   : > { %v671_v27 = vmul.f32 %v2675_v25, %v645_v7  ;;  %v672_v28 = vmul.f32 %v2678_v26, %v650_v11  ;;  %v2719_v11 = vld [vmem:[%s2639_s18 + $0x8] ss:$0 sm:$0xff] }
 0x176   : > { %v673_v29 = vmul.f32 %v671_v27, %v2675_v25  ;;  %v674_v30 = vmul.f32 %v672_v28, %v2678_v26 }
 0x178   : > { %v675_v31 = vsel %vm654_vm2, %v673_v29, 0.0  ;;  %v676_v32 = vsel %vm654_vm2, %v674_v30, 0.0 }
 0x179   : > { %v677_v33 = vadd.f32 %v676_v32, %v675_v31 }
 0x17b   : > { %678 = vadd.xlane.f32.xlu1 %v677_v33 }
 0x18c   : > { %721 = vperm.xlu1 %2331, %v639_v6  }
 0x190   : > { %2338 = vset.pattern.permute.xlu1 %v2499_v5  ;;  %v2714_v5 = vld [vmem:[%s2639_s18 + $0x7] ss:$0 sm:$0xff] }
 0x204   : > { %v679_v35 = vpop.xlane.xlu1 %678 }
 0x205   : > { %v680_v36 = vrot.slane %v679_v35, 4 }
 0x207   : > { %v681_v38 = vadd.f32 %v680_v36, %v679_v35 }
 0x208   : > { %v2690_v39 = vpop.permute.xlu1 %721 }
 0x209   : > { %v682_v40 = vrot.slane %v681_v38, 2  ;;  %v725_v41 = vmul.f32 %v2690_v39, %v2668_v9 }
 0x20b   : > { %v727_v43 = vsel %vm654_vm2, %v725_v41, 0.0  ;;  %v683_v44 = vadd.f32 %v682_v40, %v681_v38 }
 0x20c   : > { %v728_v45 = vadd.f32 %v727_v43, %v726_v42  ;;  %v2348_v43 = vld [vmem:[%s2609_s28 + $0x8] sm:$0xff]  }
 0x20d   : > { %v684_v46 = vrot.slane %v683_v44, 1  ;;  %2176 = vmatpush3.bf16.msra.mxu1 %v2348_v43 }
 0x20e   : > { %729 = vadd.xlane.f32.xlu0 %v728_v45  ;;  %2177 = vmatprep.subr.bf16.mxu1 %v2501_v50 }
 0x20f   : > { %v685_v47 = vadd.f32 %v684_v46, %v683_v44  ;;  %v2349_v44 = vld [vmem:[%s2609_s28] sm:$0xff]   ;;  %s2504_s28 = smov 96  }
 0x211   : > { %2291 = vpush %v685_v47  ;;  %2178 = vmatpush3.bf16.msra.mxu1 %v2349_v44 }
 0x212   : > { %2197 = vmatprep.subr.bf16.mxu1 %v2501_v50 }
 0x224   : > { %2333 = vrot.lane.b32.xlu0 %v2332_v59, %s2503_s17 }
 0x242   : > { %s2292_s21 = spop %2291 }
 0x243   : > { %s687_s24 = smul.f32 0.0006510417, %s2292_s21 }
 0x245   : > { %v688_v48 = vstv %s687_s24 }
 0x246   : > { %2369 = vrsqrt.f32 %v688_v48  ;;  %vm691_vm3 = vcmp.eq.f32.partialorder %v688_v48, inf  ;;  %v694_v54 = vand.u32 2147483648, %v688_v48  ;;  %vm693_vm5 = vcmp.eq.f32.partialorder %v688_v48, 0.0 }
 0x253   : > { %v2370_v52 = vpop.eup %2369 }
 0x254   : > { %v690_v53 = vmul.f32 %v2370_v52, %v688_v48 }
 0x256   : > { %v692_v55 = vsel %vm691_vm3, %v688_v48, %v690_v53 }
 0x257   : > { %v695_v56 = vsel %vm693_vm5, %v694_v54, %v692_v55 }
 0x258   : > { %2293 = vpush %v695_v56 }
 0x289   : > { %s2294_s6 = spop %2293 }
 0x28a   : > { %s697_s22 = sadd.f32 1e-05, %s2294_s6 }
 0x28c   : > { %v698_v60 = vstv %s697_s22 }
 0x28d   : > { %2371 = vrcp.f32 %v698_v60 }
 0x297   : > { %v730_v61 = vpop.xlane.xlu0 %729 }
 0x298   : > { %v731_v62 = vrot.slane %v730_v61, 4 }
 0x29a   : > { %v2372_v63 = vpop.eup %2371  ;;  %v732_v0 = vadd.f32 %v731_v62, %v730_v61  ;;  %v2350_v61 = vld [vmem:[%s3099_s3] sm:$0xff]   ;;  %v2352_v62 = vld [vmem:[%s3099_s3 + $0x8] sm:$0xff]  }
 0x29b   : > { %2295 = vpush %v2372_v63  ;;  %v2354_v63 = vld [vmem:[%s3099_s3 + $0x10] sm:$0xff]  }
 0x29c   : > { %v733_v1 = vrot.slane %v732_v0, 2 }
 0x29e   : > { %v734_v2 = vadd.f32 %v733_v1, %v732_v0 }
 0x2a0   : > { %v735_v3 = vrot.slane %v734_v2, 1 }
 0x2a2   : > { %v736_v4 = vadd.f32 %v735_v3, %v734_v2 }
 0x2a4   : > { %2297 = vpush %v736_v4 }
 0x2cc   : > { %s2296_s7 = spop %2295 }
 0x2cd   : > { %v701_v6 = vstv %s2296_s7 }
 0x2ce   : > { %v702_v7 = vmul.f32 %v701_v6, %v2675_v25  ;;  %v703_v10 = vmul.f32 %v701_v6, %v2678_v26 }
 0x2d0   : > { %v708_v12 = vmul.f32 %v2714_v5, %v702_v7  ;;  %v709_v13 = vmul.f32 %v2714_v5, %v703_v10  ;;  %v2351_v7 = vld [vmem:[%s3098_s2] sm:$0xff]   ;;  %v2353_v10 = vld [vmem:[%s3098_s2 + $0x8] sm:$0xff]  }
 0x2d2   : > { %v714_v14 = vadd.f32 %v2719_v11, %v708_v12  ;;  %v715_v15 = vadd.f32 %v2719_v11, %v709_v13 }
 0x2d4   : > { %v779_v16 = vpack.c.bf16 %v715_v15, %v714_v14 }
 0x2d5   : > { %s2298_s20 = spop %2297 }
 0x2d6   : > { %s738_s8 = smul.f32 0.0006510417, %s2298_s20  ;;  %2172 = vmatmul.mubr.msk.bf16.vlgmr.msra.gmra.mxu0 %vm654_vm2, %v779_v16 }
 0x2d7   : > { %2185 = vmatprep.mubr.msk.bf16.mxu0 %vm2502_vm4, %v2501_v50 }
 0x2d8   : > { %v739_v17 = vstv %s738_s8 }
 0x2d9   : > { %v740_v18 = vsub.f32 %v2666_v8, %v739_v17  ;;  %v741_v19 = vsub.f32 %v2668_v9, %v739_v17  ;;  %v2734_v9 = vpop.permute.xlu0 %2333 }
 0x2da   : > { %v2335_v35 = vunpack.i.l.bf16 %v2734_v9 }
 0x2db   : > { %v742_v20 = vmul.f32 %v740_v18, %v2686_v34  ;;  %v743_v21 = vmul.f32 %v741_v19, %v2690_v39  ;;  %v2336_v34 = vunpack.i.h.bf16 %v2734_v9 }
 0x2dd   : > { %v744_v22 = vmul.f32 %v742_v20, %v740_v18  ;;  %v745_v23 = vmul.f32 %v743_v21, %v741_v19 }
 0x2df   : > { %v746_v24 = vsel %vm654_vm2, %v744_v22, 0.0  ;;  %v747_v25 = vsel %vm654_vm2, %v745_v23, 0.0 }
 0x2e0   : > { %v748_v26 = vadd.f32 %v747_v25, %v746_v24 }
 0x2e2   : > { %749 = vadd.xlane.f32.xlu1 %v748_v26 }
 0x36b   : > { %v750_v27 = vpop.xlane.xlu1 %749 }
 0x36c   : > { %v751_v28 = vrot.slane %v750_v27, 4 }
 0x36e   : > { %v752_v29 = vadd.f32 %v751_v28, %v750_v27 }
 0x370   : > { %v753_v30 = vrot.slane %v752_v29, 2 }
 0x372   : > { %v754_v31 = vadd.f32 %v753_v30, %v752_v29 }
 0x374   : > { %v755_v8 = vrot.slane %v754_v31, 1 }
 0x376   : > { %v756_v32 = vadd.f32 %v755_v8, %v754_v31 }
 0x378   : > { %2299 = vpush %v756_v32 }
 0x396   : > { %v833_v33 = vpop.f32.mrf.mxu0 }
 0x397   : > { %v915_v38 = vsel %vm654_vm2, %v833_v33, %v2335_v35 }
 0x398   : > { %v2173_v36 = vpop.f32.mrf.mxu0 }
 0x39a   : > { %v836_v37 = vpop.f32.mrf.mxu0 }
 0x39b   : > { %v916_v39 = vsel %vm654_vm2, %v836_v37, %v2336_v34 }
 0x39c   : > { %v917_v40 = vpack.c.bf16 %v916_v39, %v915_v38  ;;  %v2174_v41 = vpop.f32.mrf.mxu0 }
 0x39e   : > { %2184 = vmatpush3.bf16.msra.mxu0 %v917_v40 }
 0x39f   : > { %2211 = vmatprep.subr.bf16.mxu0 %v2501_v50 }
 0x3a1   : > { %2186 = vmatmul.mubr.msk.bf16.vlgmr.msra.gmra.mxu0 %vm933_vm8, %v2350_v61  ;;  %v2358_v61 = vld [vmem:[%s2619_s14 + $0x8] sm:$0xff]  }
 0x3a2   : > { %2189 = vmatprep.mubr.msk.bf16.mxu0 %vm2502_vm4, %v2501_v50 }
 0x3a9   : > { %s2300_s21 = spop %2299  ;;  %2190 = vmatmul.mubr.msk.bf16.gmra.mxu0 %vm933_vm8, %v2352_v62 }
 0x3aa   : > { %s758_s24 = smul.f32 0.0006510417, %s2300_s21  ;;  %2193 = vmatprep.mubr.msk.bf16.mxu0 %vm2502_vm4, %v2501_v50 }
 0x3ac   : > { %v759_v42 = vstv %s758_s24 }
 0x3ad   : > { %2373 = vrsqrt.f32 %v759_v42  ;;  %vm762_vm6 = vcmp.eq.f32.partialorder %v759_v42, inf  ;;  %v765_v47 = vand.u32 2147483648, %v759_v42  ;;  %vm764_vm7 = vcmp.eq.f32.partialorder %v759_v42, 0.0 }
 0x3b1   : > { %2194 = vmatmul.mubr.msk.bf16.gmra.mxu0 %vm933_vm8, %v2354_v63 }
 0x3b2   : > { %2215 = vmatprep.mubr.msk.bf16.mxu0 %vm2502_vm4, %v2501_v50 }
 0x3ba   : > { %v2374_v45 = vpop.eup %2373 }
 0x3bb   : > { %v761_v46 = vmul.f32 %v2374_v45, %v759_v42 }
 0x3bd   : > { %v763_v48 = vsel %vm762_vm6, %v759_v42, %v761_v46 }
 0x3be   : > { %v766_v49 = vsel %vm764_vm7, %v765_v47, %v763_v48 }
 0x3bf   : > { %2301 = vpush %v766_v49 }
 0x3f0   : > { %s2302_s27 = spop %2301 }
 0x3f1   : > { %s768_s25 = sadd.f32 1e-05, %s2302_s27 }
 0x3f3   : > { %v769_v51 = vstv %s768_s25  ;;  %s2506_s25 = smov [#allocation2]  }
 0x3f4   : > { %2375 = vrcp.f32 %v769_v51 }
 0x401   : > { %v2376_v52 = vpop.eup %2375 }
 0x402   : > { %2303 = vpush %v2376_v52 }
 0x433   : > { %s2304_s30 = spop %2303 }
 0x434   : > { %v772_v53 = vstv %s2304_s30  ;;  %s1895_s30 = sshll.u32 %s2506_s25, 4  ;;  %s1896_s30 = int_to_ptr.vmem [resolvable:$true] %s1895_s30 }
 0x435   : > { %v773_v54 = vmul.f32 %v772_v53, %v740_v18  ;;  %v774_v55 = vmul.f32 %v772_v53, %v741_v19  ;;  %p2470_p9 = scmp.lt.s32.totalorder %s1896_s30, %s1896_s30 }
 0x437   : > { %v775_v56 = vmul.f32 %v2714_v5, %v773_v54  ;;  %v776_v57 = vmul.f32 %v2714_v5, %v774_v55 }
 0x439   : > { %v777_v58 = vadd.f32 %v2719_v11, %v775_v56  ;;  %v778_v59 = vadd.f32 %v2719_v11, %v776_v57  ;;  %v2355_v11 = vld [vmem:[%s3098_s2 + $0x10] sm:$0xff]  }
 0x43b   : > { %v840_v60 = vpack.c.bf16 %v778_v59, %v777_v58  ;;  %v2356_v59 = vld [vmem:[%s2614_s16 + $0x8] sm:$0xff]  }
 0x43c   : > { %2212 = vmatpush3.bf16.msra.mxu0 %v2356_v59 }
 0x43d   : > { %2180 = vmatmul.mubr.msk.bf16.vlgmr.msra.gmra.mxu1 %vm654_vm2, %v840_v60  ;;  %v2357_v60 = vld [vmem:[%s2614_s16] sm:$0xff]   ;;  %2213 = vmatprep.subr.bf16.mxu0 %v2501_v50 }
 0x43e   : > { %2199 = vmatprep.mubr.msk.bf16.mxu1 %vm2502_vm4, %v2501_v50 }
 0x440   : > { %2214 = vmatpush3.bf16.msra.mxu0 %v2357_v60 }
 0x441   : > { %2243 = vmatprep.subr.bf16.mxu0 %v2501_v50 }
 0x461   : > { %v2791_v12 = vpop.f32.mrf.mxu0 }
 0x463   : > { %v2187_v13 = vpop.f32.mrf.mxu0 }
 0x465   : > { %v2793_v14 = vpop.f32.mrf.mxu0 }
 0x467   : > { %v2188_v15 = vpop.f32.mrf.mxu0 }
 0x469   : > { %v2795_v16 = vpop.f32.mrf.mxu0 }
 0x46b   : > { %v2191_v17 = vpop.f32.mrf.mxu0 }
 0x46d   : > { %v2797_v18 = vpop.f32.mrf.mxu0 }
 0x46f   : > { %v2192_v19 = vpop.f32.mrf.mxu0 }
 0x471   : > { %v2799_v20 = vpop.f32.mrf.mxu0 }
 0x473   : > { %v2195_v21 = vpop.f32.mrf.mxu0 }
 0x475   : > { %v2801_v22 = vpop.f32.mrf.mxu0 }
 0x477   : > { %v2196_v23 = vpop.f32.mrf.mxu0 }
 0x478   : > { %v2901_v23 = vld [vmem:[%s2639_s18 + $0x1] ss:$0 sm:$0xff] }
 0x4fd   : > { %v894_v0 = vpop.f32.mrf.mxu1 }
 0x4fe   : > { %v1006_v3 = vsel %vm654_vm2, %v894_v0, %v2335_v35 }
 0x4ff   : > { %v2181_v1 = vpop.f32.mrf.mxu1 }
 0x501   : > { %v897_v2 = vpop.f32.mrf.mxu1 }
 0x502   : > { %v1007_v4 = vsel %vm654_vm2, %v897_v2, %v2336_v34 }
 0x503   : > { %v1008_v5 = vpack.c.bf16 %v1007_v4, %v1006_v3  ;;  %v2182_v6 = vpop.f32.mrf.mxu1  ;;  %v2883_v4 = vld [vmem:[%s2639_s18] ss:$0 sm:$0xff] }
 0x505   : > { %2198 = vmatpush3.bf16.msra.mxu1 %v1008_v5 }
 0x506   : > { %2227 = vmatprep.subr.bf16.mxu1 %v2501_v50 }
 0x508   : > { %2200 = vmatmul.mubr.msk.bf16.vlgmr.msra.gmra.mxu1 %vm933_vm8, %v2351_v7 }
 0x509   : > { %2203 = vmatprep.mubr.msk.bf16.mxu1 %vm2502_vm4, %v2501_v50  ;;  %2228 = vmatpush3.bf16.msra.mxu1 %v2358_v61 }
 0x50a   : > { %2229 = vmatprep.subr.bf16.mxu1 %v2501_v50 }
 0x510   : > { %2204 = vmatmul.mubr.msk.bf16.gmra.mxu1 %vm933_vm8, %v2353_v10 }
 0x511   : > { %2207 = vmatprep.mubr.msk.bf16.mxu1 %vm2502_vm4, %v2501_v50 }
 0x518   : > { %2208 = vmatmul.mubr.msk.bf16.gmra.mxu1 %vm933_vm8, %v2355_v11  ;;  %vm1645_vm8 = vcmask 392192  }
 0x519   : > { %2231 = vmatprep.mubr.msk.bf16.mxu1 %vm2502_vm4, %v2501_v50 }
 0x5c8   : > { %v2803_v24 = vpop.f32.mrf.mxu1 }
 0x5c9   : > { %v2807_v25 = vsub.f32 %v2791_v12, %v2803_v24  ;;  %v1187_v13 = vadd.f32 %v2803_v24, %v2791_v12 }
 0x5ca   : > { %v2201_v26 = vpop.f32.mrf.mxu1 }
 0x5cb   : > { %v1096_v27 = vmul.f32 %v2807_v25, %v2807_v25 }
 0x5cc   : > { %v2811_v28 = vpop.f32.mrf.mxu1 }
 0x5cd   : > { %v2815_v29 = vsub.f32 %v2793_v14, %v2811_v28  ;;  %1108 = vrot.lane.b32.xlu1 %v1096_v27, %s2504_s28 }
 0x5ce   : > { %v2202_v30 = vpop.f32.mrf.mxu1 }
 0x5cf   : > { %v1097_v31 = vmul.f32 %v2815_v29, %v2815_v29  ;;  %v1188_v30 = vadd.f32 %v2811_v28, %v2793_v14 }
 0x5d0   : > { %v2820_v8 = vpop.f32.mrf.mxu1 }
 0x5d1   : > { %v2824_v32 = vsub.f32 %v2795_v16, %v2820_v8  ;;  %1110 = vrot.lane.b32.xlu0 %v1097_v31, %s2504_s28  ;;  %v1189_v14 = vadd.f32 %v2820_v8, %v2795_v16 }
 0x5d2   : > { %v2205_v9 = vpop.f32.mrf.mxu1 }
 0x5d3   : > { %v1098_v33 = vmul.f32 %v2824_v32, %v2824_v32 }
 0x5d4   : > { %v2829_v34 = vpop.f32.mrf.mxu1 }
 0x5d5   : > { %v2833_v35 = vsub.f32 %v2797_v18, %v2829_v34  ;;  %1112 = vrot.lane.b32.xlu0 %v1098_v33, %s2504_s28 }
 0x5d6   : > { %v2206_v36 = vpop.f32.mrf.mxu1 }
 0x5d7   : > { %v1099_v37 = vmul.f32 %v2833_v35, %v2833_v35 }
 0x5d8   : > { %v2838_v38 = vpop.f32.mrf.mxu1 }
 0x5d9   : > { %v2842_v39 = vsub.f32 %v2799_v20, %v2838_v38  ;;  %1114 = vrot.lane.b32.xlu0 %v1099_v37, %s2504_s28 }
 0x5da   : > { %v2209_v40 = vpop.f32.mrf.mxu1 }
 0x5db   : > { %v1100_v41 = vmul.f32 %v2842_v39, %v2842_v39 }
 0x5dc   : > { %v2847_v42 = vpop.f32.mrf.mxu1 }
 0x5dd   : > { %v2851_v43 = vsub.f32 %v2801_v22, %v2847_v42  ;;  %1116 = vrot.lane.b32.xlu1 %v1100_v41, %s2504_s28 }
 0x5de   : > { %v2210_v44 = vpop.f32.mrf.mxu1 }
 0x5df   : > { %v1101_v45 = vmul.f32 %v2851_v43, %v2851_v43 }
 0x5e1   : > { %1118 = vrot.lane.b32.xlu0 %v1101_v45, %s2504_s28 }
 0x63f   : > { %v1109_v46 = vpop.permute.xlu1 %1108 }
 0x640   : > { %v1127_v47 = vsel %vm1126_vm9, %v1109_v46, 0.0 }
 0x641   : > { %1128 = vadd.xlane.f32.xlu1 %v1127_v47 }
 0x643   : > { %v1111_v48 = vpop.permute.xlu0 %1110 }
 0x644   : > { %v1130_v49 = vsel %vm1126_vm9, %v1111_v48, 0.0 }
 0x645   : > { %1131 = vadd.xlane.f32.xlu0 %v1130_v49 }
 0x647   : > { %v1113_v51 = vpop.permute.xlu0 %1112 }
 0x648   : > { %v1133_v52 = vsel %vm1126_vm9, %v1113_v51, 0.0 }
 0x649   : > { %1134 = vadd.xlane.f32.xlu0 %v1133_v52  ;;  %v1190_v52 = vadd.f32 %v2829_v34, %v2797_v18  ;;  %v1191_v18 = vadd.f32 %v2838_v38, %v2799_v20  ;;  %v1192_v20 = vadd.f32 %v2847_v42, %v2801_v22 }
 0x64b   : > { %v1115_v53 = vpop.permute.xlu0 %1114 }
 0x64c   : > { %v1136_v54 = vsel %vm1126_vm9, %v1115_v53, 0.0 }
 0x64d   : > { %1137 = vadd.xlane.f32.xlu1 %v1136_v54 }
 0x64f   : > { %v1117_v55 = vpop.permute.xlu1 %1116 }
 0x650   : > { %v1139_v56 = vsel %vm1126_vm9, %v1117_v55, 0.0 }
 0x651   : > { %1140 = vadd.xlane.f32.xlu0 %v1139_v56 }
 0x653   : > { %v1119_v57 = vpop.permute.xlu0 %1118 }
 0x654   : > { %v1142_v58 = vsel %vm1126_vm9, %v1119_v57, 0.0 }
 0x655   : > { %1143 = vadd.xlane.f32.xlu1 %v1142_v58 }
 0x6ca   : > { %v2869_v62 = vpop.xlane.xlu1 %1128 }
 0x6cb   : > { %2377 = vrsqrt.f32 %v2869_v62  ;;  %vm1147_vm10 = vcmp.eq.f32.partialorder %v2869_v62, inf  ;;  %v1150_v5 = vand.u32 2147483648, %v2869_v62  ;;  %vm1149_vm11 = vcmp.eq.f32.partialorder %v2869_v62, 0.0 }
 0x6ce   : > { %v2872_v63 = vpop.xlane.xlu0 %1131 }
 0x6cf   : > { %2379 = vrsqrt.f32 %v2872_v63  ;;  %vm1154_vm12 = vcmp.eq.f32.partialorder %v2872_v63, inf  ;;  %v1157_v19 = vand.u32 2147483648, %v2872_v63  ;;  %vm1156_vm13 = vcmp.eq.f32.partialorder %v2872_v63, 0.0 }
 0x6d2   : > { %v2875_v0 = vpop.xlane.xlu0 %1134 }
 0x6d3   : > { %2381 = vrsqrt.f32 %v2875_v0  ;;  %vm1161_vm14 = vcmp.eq.f32.partialorder %v2875_v0, inf  ;;  %v1164_v36 = vand.u32 2147483648, %v2875_v0  ;;  %vm1163_vm15 = vcmp.eq.f32.partialorder %v2875_v0, 0.0 }
 0x6d6   : > { %v2878_v1 = vpop.xlane.xlu1 %1137 }
 0x6d7   : > { %2383 = vrsqrt.f32 %v2878_v1  ;;  %vm1168_vm0 = vcmp.eq.f32.partialorder %v2878_v1, inf  ;;  %v1171_v48 = vand.u32 2147483648, %v2878_v1  ;;  %vm1170_vm1 = vcmp.eq.f32.partialorder %v2878_v1, 0.0 }
 0x6d8   : > { %v2378_v2 = vpop.eup %2377 }
 0x6d9   : > { %v1146_v3 = vmul.f32 %v2378_v2, %v2869_v62 }
 0x6da   : > { %v2887_v6 = vpop.xlane.xlu0 %1140 }
 0x6db   : > { %v1148_v7 = vsel %vm1147_vm10, %v2869_v62, %v1146_v3  ;;  %2385 = vrsqrt.f32 %v2887_v6  ;;  %vm1175_vm3 = vcmp.eq.f32.partialorder %v2887_v6, inf  ;;  %v1178_v57 = vand.u32 2147483648, %v2887_v6 }
 0x6dc   : > { %v2380_v10 = vpop.eup %2379  ;;  %v1151_v11 = vsel %vm1149_vm11, %v1150_v5, %v1148_v7  ;;  %vm1177_vm5 = vcmp.eq.f32.partialorder %v2887_v6, 0.0 }
 0x6dd   : > { %v1198_v15 = vmul.f32 %v2883_v4, %v1151_v11  ;;  %v1153_v17 = vmul.f32 %v2380_v10, %v2872_v63 }
 0x6de   : > { %v2898_v21 = vpop.xlane.xlu1 %1143 }
 0x6df   : > { %v1204_v26 = vadd.f32 %v1198_v15, %v1187_v13  ;;  %v1155_v27 = vsel %vm1154_vm12, %v2872_v63, %v1153_v17  ;;  %2387 = vrsqrt.f32 %v2898_v21  ;;  %vm1182_vm6 = vcmp.eq.f32.partialorder %v2898_v21, inf }
 0x6e0   : > { %v2382_v12 = vpop.eup %2381  ;;  %v1158_v24 = vsel %vm1156_vm13, %v1157_v19, %v1155_v27  ;;  %v1185_v7 = vand.u32 2147483648, %v2898_v21  ;;  %vm1184_vm7 = vcmp.eq.f32.partialorder %v2898_v21, 0.0 }
 0x6e1   : > { %v1199_v31 = vmul.f32 %v2883_v4, %v1158_v24  ;;  %v1160_v9 = vmul.f32 %v2382_v12, %v2875_v0  ;;  %v2911_v33 = vadd.f32 %v2901_v23, %v1204_v26 }
 0x6e3   : > { %v1205_v37 = vadd.f32 %v1199_v31, %v1188_v30  ;;  %v1162_v40 = vsel %vm1161_vm14, %v2875_v0, %v1160_v9  ;;  %v2070_v41 = vmul.f32 -1.442695, %v2911_v33 }
 0x6e4   : > { %v2384_v44 = vpop.eup %2383  ;;  %v1165_v28 = vsel %vm1163_vm15, %v1164_v36, %v1162_v40 }
 0x6e5   : > { %v1167_v45 = vmul.f32 %v2384_v44, %v2878_v1  ;;  %v2922_v46 = vadd.f32 %v2901_v23, %v1205_v37  ;;  %2389 = vpow2.f32 %v2070_v41  ;;  %v1200_v47 = vmul.f32 %v2883_v4, %v1165_v28 }
 0x6e7   : > { %v1169_v49 = vsel %vm1168_vm0, %v2878_v1, %v1167_v45  ;;  %v2071_v51 = vmul.f32 -1.442695, %v2922_v46  ;;  %v1206_v16 = vadd.f32 %v1200_v47, %v1189_v14 }
 0x6e8   : > { %v2386_v8 = vpop.eup %2385  ;;  %v1172_v53 = vsel %vm1170_vm1, %v1171_v48, %v1169_v49 }
 0x6e9   : > { %v1174_v54 = vmul.f32 %v2386_v8, %v2887_v6  ;;  %2391 = vpow2.f32 %v2071_v51  ;;  %v1201_v55 = vmul.f32 %v2883_v4, %v1172_v53  ;;  %v1217_v56 = vadd.f32 %v2901_v23, %v1206_v16 }
 0x6eb   : > { %v1176_v58 = vsel %vm1175_vm3, %v2887_v6, %v1174_v54  ;;  %v1207_v59 = vadd.f32 %v1201_v55, %v1190_v52  ;;  %v2072_v60 = vmul.f32 -1.442695, %v1217_v56  ;;  %v2359_v55 = vld [vmem:[%s2619_s14] sm:$0xff]  }
 0x6ec   : > { %v2388_v61 = vpop.eup %2387  ;;  %v1179_v34 = vsel %vm1177_vm5, %v1178_v57, %v1176_v58  ;;  %2230 = vmatpush3.bf16.msra.mxu1 %v2359_v55  ;;  %v2076_v57 = vld [vmem:[%s2639_s18 + $0x2] ss:$0 sm:$0xff] }
 0x6ed   : > { %v1181_v2 = vmul.f32 %v2388_v61, %v2898_v21  ;;  %v1218_v3 = vadd.f32 %v2901_v23, %v1207_v59  ;;  %2393 = vpow2.f32 %v2072_v60  ;;  %v1202_v5 = vmul.f32 %v2883_v4, %v1179_v34  ;;  %2259 = vmatprep.subr.bf16.mxu1 %v2501_v50 }
 0x6ef   : > { %v1183_v10 = vsel %vm1182_vm6, %v2898_v21, %v1181_v2  ;;  %v2073_v11 = vmul.f32 -1.442695, %v1218_v3  ;;  %v1208_v13 = vadd.f32 %v1202_v5, %v1191_v18 }
 0x6f0   : > { %v1186_v15 = vsel %vm1184_vm7, %v1185_v7, %v1183_v10 }
 0x6f1   : > { %2395 = vpow2.f32 %v2073_v11  ;;  %v1203_v38 = vmul.f32 %v2883_v4, %v1186_v15  ;;  %v1219_v17 = vadd.f32 %v2901_v23, %v1208_v13 }
 0x6f2   : > { %v2390_v19 = vpop.eup %2389 }
 0x6f3   : > { %v1239_v26 = vadd.f32 1.0, %v2390_v19  ;;  %v1209_v27 = vadd.f32 %v1203_v38, %v1192_v20  ;;  %v2074_v12 = vmul.f32 -1.442695, %v1219_v17 }
 0x6f5   : > { %v1220_v24 = vadd.f32 %v2901_v23, %v1209_v27  ;;  %2397 = vpow2.f32 %v2074_v12  ;;  %v2360_v12 = vld [vmem:[%s2624_s23 + $0x8] sm:$0xff]  }
 0x6f6   : > { %v2392_v30 = vpop.eup %2391  ;;  %2399 = vrcp.f32 %v1239_v26 }
 0x6f7   : > { %v1240_v31 = vadd.f32 1.0, %v2392_v30  ;;  %v2075_v9 = vmul.f32 -1.442695, %v1220_v24  ;;  %v2082_v30 = vld [vmem:[%s2639_s18 + $0x3] ss:$0 sm:$0xff] }
 0x6f9   : > { %2401 = vrcp.f32 %v1240_v31 }
 0x6fa   : > { %v2394_v36 = vpop.eup %2393  ;;  %2403 = vpow2.f32 %v2075_v9 }
 0x6fb   : > { %v1241_v22 = vadd.f32 1.0, %v2394_v36 }
 0x6fd   : > { %2405 = vrcp.f32 %v1241_v22 }
 0x6fe   : > { %v2396_v42 = vpop.eup %2395 }
 0x6ff   : > { %v1242_v37 = vadd.f32 1.0, %v2396_v42 }
 0x701   : > { %2407 = vrcp.f32 %v1242_v37 }
 0x702   : > { %v2398_v4 = vpop.eup %2397 }
 0x703   : > { %v2400_v40 = vpop.eup %2399  ;;  %v1243_v41 = vadd.f32 1.0, %v2398_v4 }
 0x704   : > { %v1257_v23 = vmul.f32 %v2400_v40, %v2911_v33 }
 0x705   : > { %2409 = vrcp.f32 %v1243_v41 }
 0x706   : > { %v2402_v44 = vpop.eup %2401 }
 0x707   : > { %v2404_v14 = vpop.eup %2403  ;;  %v1258_v28 = vmul.f32 %v2402_v44, %v2922_v46 }
 0x708   : > { %v1244_v45 = vadd.f32 1.0, %v2404_v14 }
 0x709   : > { %v1263_v47 = vpack.c.bf16 %v1258_v28, %v1257_v23 }
 0x70a   : > { %2411 = vrcp.f32 %v1244_v45  ;;  %v2406_v48 = vpop.eup %2405 }
 0x70b   : > { %2216 = vmatmul.mubr.msk.bf16.vlgmr.msra.gmra.mxu0 %vm654_vm2, %v1263_v47  ;;  %v1259_v51 = vmul.f32 %v2406_v48, %v1217_v56 }
 0x70c   : > { %2219 = vmatprep.mubr.msk.bf16.mxu0 %vm2502_vm4, %v2501_v50  ;;  %2244 = vmatpush3.bf16.msra.mxu0 %v2360_v12 }
 0x70d   : > { %2245 = vmatprep.subr.bf16.mxu0 %v2501_v50 }
 0x70e   : > { %v2408_v49 = vpop.eup %2407 }
 0x70f   : > { %v1260_v16 = vmul.f32 %v2408_v49, %v1218_v3 }
 0x711   : > { %v1264_v8 = vpack.c.bf16 %v1260_v16, %v1259_v51 }
 0x712   : > { %v2410_v33 = vpop.eup %2409 }
 0x713   : > { %2220 = vmatmul.mubr.msk.bf16.gmra.mxu0 %vm654_vm2, %v1264_v8  ;;  %v1261_v52 = vmul.f32 %v2410_v33, %v1219_v17 }
 0x714   : > { %2223 = vmatprep.mubr.msk.bf16.mxu0 %vm2502_vm4, %v2501_v50 }
 0x717   : > { %v2412_v46 = vpop.eup %2411 }
 0x718   : > { %v1262_v53 = vmul.f32 %v2412_v46, %v1220_v24  ;;  %v2361_v24 = vld [vmem:[%s2624_s23] sm:$0xff]   ;;  %s3122_s23 = sld [smem:[#allocation6_spill]] }
 0x719   : > { %2246 = vmatpush3.bf16.msra.mxu0 %v2361_v24 }
 0x71a   : > { %v1265_v54 = vpack.c.bf16 %v1262_v53, %v1261_v52  ;;  %2281 = vmatprep.subr.bf16.mxu0 %v2501_v50 }
 0x71c   : > { %2224 = vmatmul.mubr.msk.bf16.gmra.mxu0 %vm654_vm2, %v1265_v54 }
 0x71d   : > { %2247 = vmatprep.mubr.msk.bf16.mxu0 %vm2502_vm4, %v2501_v50 }
 0x7cb   : > { %v1330_v56 = vpop.f32.mrf.mxu0 }
 0x7cc   : > { %v2967_v60 = vadd.f32 %v2076_v57, %v1330_v56 }
 0x7cd   : > { %v2217_v58 = vpop.f32.mrf.mxu0 }
 0x7cf   : > { %v1333_v59 = vpop.f32.mrf.mxu0 }
 0x7d0   : > { %v2969_v61 = vadd.f32 %v2076_v57, %v1333_v59 }
 0x7d1   : > { %v2218_v18 = vpop.f32.mrf.mxu0 }
 0x7d2   : > { %v1353_v34 = vpack.c.bf16 %v2969_v61, %v2967_v60 }
 0x7d3   : > { %v1338_v2 = vpop.f32.mrf.mxu0 }
 0x7d4   : > { %2232 = vmatmul.mubr.msk.bf16.vlgmr.msra.gmra.mxu1 %vm654_vm2, %v1353_v34  ;;  %v2976_v7 = vadd.f32 %v2076_v57, %v1338_v2 }
 0x7d5   : > { %v2221_v3 = vpop.f32.mrf.mxu0  ;;  %2235 = vmatprep.mubr.msk.bf16.mxu1 %vm2502_vm4, %v2501_v50 }
 0x7d7   : > { %v1341_v5 = vpop.f32.mrf.mxu0 }
 0x7d8   : > { %v2978_v10 = vadd.f32 %v2076_v57, %v1341_v5 }
 0x7d9   : > { %v2222_v11 = vpop.f32.mrf.mxu0 }
 0x7da   : > { %v1354_v13 = vpack.c.bf16 %v2978_v10, %v2976_v7 }
 0x7dc   : > { %v1346_v15 = vpop.f32.mrf.mxu0  ;;  %2236 = vmatmul.mubr.msk.bf16.gmra.mxu1 %vm654_vm2, %v1354_v13 }
 0x7dd   : > { %2239 = vmatprep.mubr.msk.bf16.mxu1 %vm2502_vm4, %v2501_v50  ;;  %v2985_v17 = vadd.f32 %v2076_v57, %v1346_v15 }
 0x7de   : > { %v2225_v20 = vpop.f32.mrf.mxu0 }
 0x7e0   : > { %v1349_v38 = vpop.f32.mrf.mxu0 }
 0x7e1   : > { %v2987_v19 = vadd.f32 %v2076_v57, %v1349_v38 }
 0x7e2   : > { %v2226_v26 = vpop.f32.mrf.mxu0 }
 0x7e3   : > { %v1355_v27 = vpack.c.bf16 %v2987_v19, %v2985_v17 }
 0x7e5   : > { %2240 = vmatmul.mubr.msk.bf16.gmra.mxu1 %vm654_vm2, %v1355_v27 }
 0x7e6   : > { %2265 = vmatprep.mubr.msk.bf16.mxu1 %vm2502_vm4, %v2501_v50 }
 0x894   : > { %v1420_v31 = vpop.f32.mrf.mxu1 }
 0x895   : > { %v1421_v9 = vadd.f32 %v2082_v30, %v1420_v31 }
 0x896   : > { %v2233_v36 = vpop.f32.mrf.mxu1 }
 0x897   : > { %v2088_v22 = vmul.f32 -1.442695, %v1421_v9 }
 0x898   : > { %v1423_v42 = vpop.f32.mrf.mxu1 }
 0x899   : > { %2413 = vpow2.f32 %v2088_v22  ;;  %v1424_v37 = vadd.f32 %v2082_v30, %v1423_v42 }
 0x89a   : > { %v2234_v4 = vpop.f32.mrf.mxu1 }
 0x89b   : > { %v2089_v40 = vmul.f32 -1.442695, %v1424_v37  ;;  %v1577_v4 = vmax.f32 %v2875_v0, 1e-16 }
 0x89c   : > { %v1428_v41 = vpop.f32.mrf.mxu1 }
 0x89d   : > { %2415 = vpow2.f32 %v2089_v40  ;;  %v1429_v44 = vadd.f32 %v2082_v30, %v1428_v41  ;;  %v1578_v40 = vmax.f32 %v2878_v1, 1e-16 }
 0x89e   : > { %v2237_v14 = vpop.f32.mrf.mxu1 }
 0x89f   : > { %v2090_v23 = vmul.f32 -1.442695, %v1429_v44 }
 0x8a0   : > { %v1431_v28 = vpop.f32.mrf.mxu1 }
 0x8a1   : > { %2417 = vpow2.f32 %v2090_v23  ;;  %v1432_v45 = vadd.f32 %v2082_v30, %v1431_v28  ;;  %v1580_v28 = vmax.f32 %v2898_v21, 1e-16 }
 0x8a2   : > { %v2238_v47 = vpop.f32.mrf.mxu1 }
 0x8a3   : > { %v2091_v48 = vmul.f32 -1.442695, %v1432_v45  ;;  %v2094_v47 = vld [vmem:[%s2639_s18 + $0x4] ss:$0 sm:$0xff] }
 0x8a5   : > { %2419 = vpow2.f32 %v2091_v48  ;;  %v1436_v49 = vpop.f32.mrf.mxu1 }
 0x8a6   : > { %v2414_v51 = vpop.eup %2413  ;;  %v1437_v16 = vadd.f32 %v2082_v30, %v1436_v49 }
 0x8a7   : > { %v1461_v8 = vadd.f32 1.0, %v2414_v51  ;;  %v2241_v33 = vpop.f32.mrf.mxu1 }
 0x8a8   : > { %v2092_v46 = vmul.f32 -1.442695, %v1437_v16 }
 0x8a9   : > { %v1439_v52 = vpop.f32.mrf.mxu1 }
 0x8aa   : > { %v2416_v53 = vpop.eup %2415  ;;  %2421 = vpow2.f32 %v2092_v46  ;;  %v1440_v54 = vadd.f32 %v2082_v30, %v1439_v52 }
 0x8ab   : > { %2423 = vrcp.f32 %v1461_v8  ;;  %v1462_v55 = vadd.f32 1.0, %v2416_v53  ;;  %v2242_v56 = vpop.f32.mrf.mxu1 }
 0x8ac   : > { %v2093_v57 = vmul.f32 -1.442695, %v1440_v54 }
 0x8ad   : > { %2425 = vrcp.f32 %v1462_v55 }
 0x8ae   : > { %v2418_v58 = vpop.eup %2417  ;;  %2427 = vpow2.f32 %v2093_v57 }
 0x8af   : > { %v1463_v59 = vadd.f32 1.0, %v2418_v58 }
 0x8b1   : > { %2429 = vrcp.f32 %v1463_v59 }
 0x8b2   : > { %v2420_v18 = vpop.eup %2419 }
 0x8b3   : > { %v1464_v34 = vadd.f32 1.0, %v2420_v18 }
 0x8b5   : > { %2431 = vrcp.f32 %v1464_v34 }
 0x8b7   : > { %v2422_v2 = vpop.eup %2421 }
 0x8b8   : > { %v2424_v3 = vpop.eup %2423  ;;  %v1465_v5 = vadd.f32 1.0, %v2422_v2 }
 0x8b9   : > { %v1479_v15 = vmul.f32 %v2424_v3, %v1421_v9 }
 0x8ba   : > { %v2426_v11 = vpop.eup %2425  ;;  %2433 = vrcp.f32 %v1465_v5 }
 0x8bb   : > { %v2428_v13 = vpop.eup %2427  ;;  %v1480_v20 = vmul.f32 %v2426_v11, %v1424_v37 }
 0x8bc   : > { %v1466_v38 = vadd.f32 1.0, %v2428_v13 }
 0x8bd   : > { %v1485_v26 = vpack.c.bf16 %v1480_v20, %v1479_v15 }
 0x8be   : > { %2435 = vrcp.f32 %v1466_v38  ;;  %v2430_v27 = vpop.eup %2429 }
 0x8bf   : > { %2248 = vmatmul.mubr.msk.bf16.vlgmr.msra.gmra.mxu0 %vm654_vm2, %v1485_v26  ;;  %v1481_v24 = vmul.f32 %v2430_v27, %v1429_v44  ;;  %2437 = vrsqrt.f32 %v1577_v4  ;;  %v1579_v44 = vmax.f32 %v2887_v6, 1e-16  ;;  %v1576_v6 = vmax.f32 %v2872_v63, 1e-16  ;;  %v2366_v4 = vld [vmem:[%s2629_s26] sm:$0xff]  }
 0x8c0   : > { %2251 = vmatprep.mubr.msk.bf16.mxu0 %vm2502_vm4, %v2501_v50  ;;  %2439 = vrsqrt.f32 %v1578_v40 }
 0x8c1   : > { %2441 = vrsqrt.f32 %v1579_v44 }
 0x8c2   : > { %v2432_v12 = vpop.eup %2431  ;;  %2443 = vrsqrt.f32 %v1580_v28  ;;  %v2457_v28 = vld [vmem:[%s3101_s5] sm:$0xff] }
 0x8c3   : > { %v1482_v30 = vmul.f32 %v2432_v12, %v1432_v45 }
 0x8c5   : > { %v1486_v31 = vpack.c.bf16 %v1482_v30, %v1481_v24 }
 0x8c7   : > { %2252 = vmatmul.mubr.msk.bf16.gmra.mxu0 %vm654_vm2, %v1486_v31  ;;  %v2434_v9 = vpop.eup %2433 }
 0x8c8   : > { %2255 = vmatprep.mubr.msk.bf16.mxu0 %vm2502_vm4, %v2501_v50  ;;  %v1483_v22 = vmul.f32 %v2434_v9, %v1437_v16  ;;  %v1575_v16 = vmax.f32 %v2869_v62, 1e-16 }
 0x8ca   : > { %2445 = vrsqrt.f32 %v1575_v16 }
 0x8cb   : > { %v2436_v36 = vpop.eup %2435  ;;  %2447 = vrsqrt.f32 %v1576_v6 }
 0x8cc   : > { %v1484_v42 = vmul.f32 %v2436_v36, %v1440_v54  ;;  %v2438_v51 = vpop.eup %2437 }
 0x8cd   : > { %v2440_v46 = vpop.eup %2439 }
 0x8ce   : > { %v1487_v37 = vpack.c.bf16 %v1484_v42, %v1483_v22  ;;  %v2442_v55 = vpop.eup %2441 }
 0x8cf   : > { %v2444_v59 = vpop.eup %2443 }
 0x8d0   : > { %2256 = vmatmul.mubr.msk.bf16.gmra.mxu0 %vm654_vm2, %v1487_v37  ;;  %v2365_v37 = vld [vmem:[%s2629_s26 + $0x8] sm:$0xff]  }
 0x8d1   : > { %2285 = vmatprep.mubr.msk.bf16.mxu0 %vm2502_vm4, %v2501_v50 }
 0x8d7   : > { %v2446_v3 = vpop.eup %2445 }
 0x8d8   : > { %v2448_v11 = vpop.eup %2447 }
 0x97f   : > { %v1552_v41 = vpop.f32.mrf.mxu0 }
 0x980   : > { %v1553_v34 = vadd.f32 %v2094_v47, %v1552_v41 }
 0x981   : > { %v2249_v14 = vpop.f32.mrf.mxu0 }
 0x982   : > { %v1587_v5 = vmul.f32 %v2446_v3, %v1553_v34 }
 0x983   : > { %v1555_v23 = vpop.f32.mrf.mxu0 }
 0x984   : > { %v1556_v63 = vadd.f32 %v2094_v47, %v1555_v23 }
 0x985   : > { %v2250_v45 = vpop.f32.mrf.mxu0 }
 0x986   : > { %v1588_v13 = vmul.f32 %v2448_v11, %v1556_v63  ;;  %v2458_v45 = vld [vmem:[%s3101_s5 + $0x8] sm:$0xff] }
 0x987   : > { %v1560_v48 = vpop.f32.mrf.mxu0 }
 0x988   : > { %v1561_v49 = vadd.f32 %v2094_v47, %v1560_v48 }
 0x989   : > { %v2253_v0 = vpop.f32.mrf.mxu0 }
 0x98a   : > { %v1589_v8 = vmul.f32 %v2438_v51, %v1561_v49  ;;  %v2459_v51 = vld [vmem:[#allocation2 + $0x8] sm:$0xff]  ;;  %v2460_v0 = vld [vmem:[#allocation2] sm:$0xff] }
 0x98b   : > { %v1563_v1 = vpop.f32.mrf.mxu0 }
 0x98c   : > { %v1564_v33 = vadd.f32 %v2094_v47, %v1563_v1  ;;  %1605 = vperm.xlu1 %2338, %v1589_v8  }
 0x98d   : > { %v2254_v52 = vpop.f32.mrf.mxu0 }
 0x98e   : > { %v1590_v53 = vmul.f32 %v2440_v46, %v1564_v33 }
 0x990   : > { %v1568_v21 = vpop.f32.mrf.mxu0  ;;  %1610 = vperm.xlu1 %2338, %v1590_v53   ;;  %v2367_v53 = vld [vmem:[%s2634_s29 + $0x8] sm:$0xff]  }
 0x991   : > { %v1569_v54 = vadd.f32 %v2094_v47, %v1568_v21  ;;  %2282 = vmatpush3.bf16.msra.mxu0 %v2367_v53  ;;  %v2368_v21 = vld [vmem:[%s2634_s29] sm:$0xff]  }
 0x992   : > { %v2257_v56 = vpop.f32.mrf.mxu0  ;;  %2283 = vmatprep.subr.bf16.mxu0 %v2501_v50 }
 0x993   : > { %v1591_v57 = vmul.f32 %v2442_v55, %v1569_v54  ;;  %v2461_v55 = vld [vmem:[%s3111_s15] sm:$0xff] }
 0x994   : > { %v1571_v62 = vpop.f32.mrf.mxu0 }
 0x995   : > { %v1572_v58 = vadd.f32 %v2094_v47, %v1571_v62  ;;  %1615 = vperm.xlu0 %2337, %v1591_v57   ;;  %2284 = vmatpush3.bf16.msra.mxu0 %v2368_v21  ;;  %v2462_v62 = vld [vmem:[%s3111_s15 + $0x8] sm:$0xff] }
 0x996   : > { %v2258_v18 = vpop.f32.mrf.mxu0 }
 0x997   : > { %v1592_v2 = vmul.f32 %v2444_v59, %v1572_v58 }
 0x999   : > { %1620 = vperm.xlu1 %2338, %v1592_v2  }
 0x99d   : > { %1595 = vperm.xlu1 %2338, %v1587_v5  }
 0x9a1   : > { %1600 = vperm.xlu1 %2338, %v1588_v13  }
 0xa07   : > { %v1606_v15 = vpop.permute.xlu1 %1605 }
 0xa08   : > { %v1625_v30 = vmul.f32 %v1606_v15, %v2824_v32 }
 0xa0b   : > { %v1611_v20 = vpop.permute.xlu1 %1610 }
 0xa0c   : > { %v1626_v12 = vmul.f32 %v1611_v20, %v2833_v35 }
 0xa0e   : > { %v1632_v42 = vsel %vm654_vm2, %v2978_v10, %v1626_v12 }
 0xa10   : > { %v1616_v38 = vpop.permute.xlu0 %1615 }
 0xa11   : > { %v1627_v26 = vmul.f32 %v1616_v38, %v2842_v39  ;;  %v1631_v39 = vsel %vm654_vm2, %v2976_v7, %v1625_v30 }
 0xa12   : > { %v1636_v32 = vpack.c.bf16 %v1632_v42, %v1631_v39 }
 0xa13   : > { %v1633_v31 = vsel %vm654_vm2, %v2985_v17, %v1627_v26 }
 0xa14   : > { %v1621_v27 = vpop.permute.xlu1 %1620 }
 0xa15   : > { %v1628_v24 = vmul.f32 %v1621_v27, %v2851_v43 }
 0xa17   : > { %v1634_v9 = vsel %vm654_vm2, %v2987_v19, %v1628_v24 }
 0xa18   : > { %v1637_v36 = vpack.c.bf16 %v1634_v9, %v1633_v31  ;;  %v1596_v22 = vpop.permute.xlu1 %1595  ;;  %v2110_v31 = vld [vmem:[%s2639_s18 + $0x6] ss:$0 sm:$0xff] }
 0xa19   : > { %v1623_v35 = vmul.f32 %v1596_v22, %v2807_v25  ;;  %v2362_v25 = vld [vmem:[%s3122_s23] sm:$0xff]  }
 0xa1a   : > { %2260 = vmatpush3.bf16.msra.mxu1 %v1637_v36 }
 0xa1b   : > { %2261 = vmatprep.subr.bf16.mxu1 %v2501_v50  ;;  %v1629_v19 = vsel %vm654_vm2, %v2967_v60, %v1623_v35  ;;  %v2363_v60 = vld [vmem:[%s2629_s26 + $0x18] sm:$0xff]  }
 0xa1c   : > { %v1601_v43 = vpop.permute.xlu1 %1600 }
 0xa1d   : > { %v1624_v17 = vmul.f32 %v1601_v43, %v2815_v29  ;;  %v2505_v29 = vmov 2  }
 0xa1e   : > { %2262 = vmatpush3.bf16.msra.mxu1 %v1636_v32  ;;  %2344 = vset.pattern.permute.xlu1 %v2505_v29 }
 0xa1f   : > { %v1630_v10 = vsel %vm654_vm2, %v2969_v61, %v1624_v17  ;;  %2263 = vmatprep.subr.bf16.mxu1 %v2501_v50  ;;  %2345 = vset.pattern.permute.xlu0 %v2505_v29  ;;  %v2364_v61 = vld [vmem:[%s2629_s26 + $0x10] sm:$0xff]  }
 0xa20   : > { %v1635_v7 = vpack.c.bf16 %v1630_v10, %v1629_v19 }
 0xa22   : > { %2264 = vmatpush3.bf16.msra.mxu1 %v1635_v7 }
 0xa23   : > { %2269 = vmatprep.subr.bf16.mxu1 %v2501_v50 }
 0xa25   : > { %2266 = vmatmul.mubr.msk.bf16.vlgmr.msra.gmra.mxu1 %vm1645_vm8, %v2362_v25 }
 0xa26   : > { %2277 = vmatprep.mubr.msk.bf16.mxu1 %vm2502_vm4, %v2501_v50  ;;  %2270 = vmatpush3.bf16.msra.mxu1 %v2363_v60  ;;  %vm1748_vm4 = vcmask 523264  }
 0xa27   : > { %2271 = vmatprep.subr.bf16.mxu1 %v2501_v50 }
 0xa2a   : > { %2272 = vmatpush3.bf16.msra.mxu1 %v2364_v61 }
 0xa2b   : > { %2273 = vmatprep.subr.bf16.mxu1 %v2501_v50 }
 0xa2e   : > { %2274 = vmatpush3.bf16.msra.mxu1 %v2365_v37 }
 0xa2f   : > { %2275 = vmatprep.subr.bf16.mxu1 %v2501_v50  ;;  %v2102_v50 = vld [vmem:[%s2639_s18 + $0x5] ss:$0 sm:$0xff] }
 0xa32   : > { %2276 = vmatpush3.bf16.msra.mxu1 %v2366_v4 }
 0xae5   : > { %v1683_v40 = vpop.f32.mrf.mxu1 }
 0xae7   : > { %v2267_v41 = vpop.f32.mrf.mxu1 }
 0xae9   : > { %v1686_v44 = vpop.f32.mrf.mxu1 }
 0xaea   : > { %v2339_v14 = vpack.i.bf16 %v1686_v44, %v1683_v40 }
 0xaeb   : > { %v2268_v23 = vpop.f32.mrf.mxu1 }
 0xaec   : > { %2340 = vrot.lane.b32.xlu1 %v2339_v14, %s2503_s17 }
 0xaf0   : > { %1691 = vperm.xlu1 %2344, %v2457_v28  }
 0xaf4   : > { %1695 = vperm.xlu1 %2344, %v2458_v45  }
 0xb5e   : > { %v2341_v47 = vpop.permute.xlu1 %2340 }
 0xb5f   : > { %v2343_v48 = vunpack.i.h.bf16 %v2341_v47  ;;  %v2342_v49 = vunpack.i.l.bf16 %v2341_v47 }
 0xb61   : > { %v1709_v16 = vsel %vm654_vm2, %v2459_v51, %v2343_v48  ;;  %v1708_v8 = vsel %vm654_vm2, %v2460_v0, %v2342_v49 }
 0xb62   : > { %v1710_v1 = vpack.c.bf16 %v1709_v16, %v1708_v8 }
 0xb64   : > { %2278 = vmatmul.mubr.msk.bf16.vlgmr.msra.gmra.mxu1 %vm1748_vm4, %v1710_v1 }
 0xb6b   : > { %v1692_v33 = vpop.permute.xlu1 %1691 }
 0xb6c   : > { %v1698_v46 = vmul.f32 %v1692_v33, %v1683_v40 }
 0xb6e   : > { %1879 = vrot.lane.b32.xlu0 %v1698_v46, %s2504_s28 }
 0xb6f   : > { %v1696_v6 = vpop.permute.xlu1 %1695 }
 0xb70   : > { %v1699_v52 = vmul.f32 %v1696_v6, %v1686_v44 }
 0xb72   : > { %1881 = vrot.lane.b32.xlu1 %v1699_v52, %s2504_s28  ;;  %s2463_s28 = scalar_lea.vmem %s1896_s30, 256 }
 0xb73   : > { %p2464_p6 = scmp.ne.s32.totalorder %s1896_s30, %s2463_s28  ;;  %p2471_p10 = scmp.lt.s32.totalorder %s2463_s28, %s2463_s28 }
 0xb75   : > { %p2465_p7 = pnand %p2464_p6, %p2309_p5  ;;  %p2472_p11 = por %p2471_p10, %p2470_p9 }
 0xb77   : > { %p2466_p8 = pneg %p2465_p7 }
 0xb79   : > { %p2473_p12 = pnand %p2472_p11, %p2466_p8 }
 0xbe0   : > { %v1880_v54 = vpop.permute.xlu0 %1879 }
 0xbe1   : > { %v1885_v56 = vadd.f32 %v2461_v55, %v1880_v54 }
 0xbe3   : > { %1887 = vst.msk [vmem:[%s3111_s15] sm:$0xff] %vm1126_vm9, %v1885_v56 }
 0xbe4   : > { %v1882_v57 = vpop.permute.xlu1 %1881 }
 0xbe5   : > { %v1886_v58 = vadd.f32 %v2462_v62, %v1882_v57 }
 0xbe7   : > { %1888 = vst.msk [vmem:[%s3111_s15 + $0x8] sm:$0xff] %vm1126_vm9, %v1886_v58 }
 0xc24   : > { %v1786_v59 = vpop.f32.mrf.mxu1 }
 0xc25   : > { %v1787_v18 = vadd.f32 %v2102_v50, %v1786_v59 }
 0xc26   : > { %v2279_v34 = vpop.f32.mrf.mxu1 }
 0xc27   : > { %v2108_v2 = vmul.f32 -1.442695, %v1787_v18 }
 0xc28   : > { %v1789_v3 = vpop.f32.mrf.mxu1 }
 0xc29   : > { %2449 = vpow2.f32 %v2108_v2  ;;  %v1790_v5 = vadd.f32 %v2102_v50, %v1789_v3 }
 0xc2a   : > { %v2280_v63 = vpop.f32.mrf.mxu1 }
 0xc2b   : > { %v2109_v11 = vmul.f32 -1.442695, %v1790_v5 }
 0xc2d   : > { %2451 = vpow2.f32 %v2109_v11 }
 0xc36   : > { %v2450_v13 = vpop.eup %2449 }
 0xc37   : > { %v1799_v15 = vadd.f32 1.0, %v2450_v13 }
 0xc39   : > { %2453 = vrcp.f32 %v1799_v15 }
 0xc3a   : > { %v2452_v20 = vpop.eup %2451 }
 0xc3b   : > { %v1800_v38 = vadd.f32 1.0, %v2452_v20 }
 0xc3d   : > { %2455 = vrcp.f32 %v1800_v38 }
 0xc46   : > { %v2454_v26 = vpop.eup %2453 }
 0xc47   : > { %v1805_v12 = vmul.f32 %v2454_v26, %v1787_v18 }
 0xc4a   : > { %v2456_v27 = vpop.eup %2455 }
 0xc4b   : > { %v1806_v24 = vmul.f32 %v2456_v27, %v1790_v5 }
 0xc4d   : > { %v1807_v30 = vpack.c.bf16 %v1806_v24, %v1805_v12 }
 0xc4f   : > { %2286 = vmatmul.mubr.msk.bf16.vlgmr.msra.gmra.mxu0 %vm654_vm2, %v1807_v30 }
 0xd0f   : > { %v1866_v9 = vpop.f32.mrf.mxu0 }
 0xd10   : > { %v1867_v36 = vadd.f32 %v2110_v31, %v1866_v9 }
 0xd11   : > { %v2287_v22 = vpop.f32.mrf.mxu0 }
 0xd12   : > { %v1873_v42 = vadd.f32 %v2460_v0, %v1867_v36 }
 0xd13   : > { %v1869_v39 = vpop.f32.mrf.mxu0 }
 0xd14   : > { %1875 = vst.msk [vmem:[#allocation2] sm:$0xff] %vm654_vm2, %v1873_v42  ;;  %v1870_v35 = vadd.f32 %v2110_v31, %v1869_v39 }
 0xd15   : > { %v2288_v32 = vpop.f32.mrf.mxu0 }
 0xd16   : > { %v1874_v43 = vadd.f32 %v2459_v51, %v1870_v35 }
 0xd18   : > { %1876 = vst.msk [vmem:[#allocation2 + $0x8] sm:$0xff] %vm654_vm2, %v1874_v43 }
 0xd19   : > { %2476 = shalt.err (!%p2473_p12)
}
 0xd1a   : > { %s2507_s18 = smov 128   ;;  %s2508_s14 = smov 8  }
 0xd1b   : > { %s3123_s4 = sld [smem:[#allocation10_spill]] }
 0xd21   : > { %2306 = dma.vmem_to_hbm [thread:$0]  (%p2309_p5), %s1896_s30, 256, %s3123_s4, [#allocation3], %s2507_s18, %s2507_s18, %s2508_s14  }
 0xd22   : > { %2492 = dma.done.wait (%p2309_p5), [#allocation3], 256  }
 0xd23   : > { %2494 = vsyncadd (%p2309_p5), [#allocation3], 4294967040 }
 0xd24 PF: > { %s3124_s6 = sld [smem:[#allocation5_spill]] }
 0xd2a   : > { %s27_s18 = sadd.s32 1, %s3124_s6  }
 0xd2b   : > { %p24_p13 = scmp.ge.s32.totalorder %s27_s18, 4  }
 0xd2d   :  { %26 = sbr.rel (!%p24_p13) target bundleno = 7 (0x7), region = 136 }
 0xd32   :  { %1917 = vsyncpa [#allocation3], 1 }
 0xd33   :  { %1919 = vsyncpa [#allocation3 + $0x1], 1 }

</bundles_post_ra>
